<compile_context>
chip_gen: v5e
topology: v5e:2x2
jax: 0.10.0
libtpu: 0.0.40
codegen_flags: <defaults>
</compile_context>

<pallas_src>
import functools

import jax
import jax.numpy as jnp
from jax.experimental import pallas as pl
from jax.experimental.pallas import tpu as pltpu

HIDDEN_DIM = 100
INPUT_DIM = 28
LAYER_DIM = 1          # single-layer LSTM (matches module config)
OUTPUT_DIM = 10
LANE = 128             # TPU lane width


def _round_up(n, m):
    return (n + m - 1) // m * m


def _pad2(a, rows, cols):
    return jnp.pad(a, ((0, rows - a.shape[0]), (0, cols - a.shape[1])))


def lstm_kernel(x_ref, wih_ref, whh_ref, b_ref, wfc_ref, bfc_ref, out_ref):
    """Whole sequence in one invocation.

    x_ref:   (S, B, Dp)   bf16  time-major, feature-padded input
    wih_ref: (Dp, 4*Hp)   bf16  W_ih^T, gate order i,f,o,g, per-gate zero-padded H->Hp
    whh_ref: (Hp, 4*Hp)   bf16  W_hh^T, same layout
    b_ref:   (1, 4*Hp)    f32   fused bias (b_ih + b_hh), same gate order / padding
    wfc_ref: (Hp, Op)     bf16  fc weight, transposed and padded
    bfc_ref: (1, Op)      f32
    out_ref: (B, Op)      f32   lane-dense output (sliced back to O in the wrapper)
    """
    S, B, Dp = x_ref.shape
    Hp = wfc_ref.shape[0]

    # --- Hoisted input projection (off the recurrent critical path) -------------------
    # One (S*B, Dp) x (Dp, 4Hp) MXU call with the bias folded in; kept in f32.
    x_all = x_ref[...].reshape(S * B, Dp)
    xw = jnp.dot(x_all, wih_ref[...], preferred_element_type=jnp.float32) + b_ref[...]

    whh = whh_ref[...]                                   # bf16 (Hp, 4Hp), loaded once

    # --- Serial recurrence: only h @ W_hh remains per step ----------------------------
    h = jnp.zeros((B, Hp), jnp.float32)
    c = jnp.zeros((B, Hp), jnp.float32)
    for t in range(S):                                   # S is small & static: full unroll
        gates = xw[t * B:(t + 1) * B, :] + jnp.dot(
            h.astype(jnp.bfloat16), whh, preferred_element_type=jnp.float32)
        # i | f | o are contiguous -> one wide sigmoid; g is the last Hp lanes.
        # NOTE: relies on every gate block being exactly Hp zero-padded so padded lanes
        # of c/h stay exactly 0 across all timesteps.
        sig = jax.nn.sigmoid(gates[:, :3 * Hp])
        g_g = jnp.tanh(gates[:, 3 * Hp:])
        i_g = sig[:, 0:Hp]
        f_g = sig[:, Hp:2 * Hp]
        o_g = sig[:, 2 * Hp:3 * Hp]
        c = f_g * c + i_g * g_g
        h = o_g * jnp.tanh(c)

    out_ref[...] = (jnp.dot(h.astype(jnp.bfloat16), wfc_ref[...],
                            preferred_element_type=jnp.float32)
                    + bfc_ref[...])


# -------------------------- one-time weight packing (not jitted per call) -------------
def _pack_gates(w, Kp, Hp):
    """w: (4H, K) in torch gate order (i,f,g,o). Returns (Kp, 4*Hp) transposed weight,
    columns in gate order (i,f,o,g), each gate block zero-padded H->Hp, rows K->Kp."""
    H = w.shape[0] // 4
    i, f, g, o = jnp.split(w, 4, axis=0)                 # each (H, K)
    del H
    return jnp.concatenate([_pad2(blk.T, Kp, Hp) for blk in (i, f, o, g)], axis=1)


def _pack_bias(b, H, Hp):
    i, f, g, o = jnp.split(b, 4)
    return jnp.concatenate(
        [jnp.pad(blk, (0, Hp - H)) for blk in (i, f, o, g)]).reshape(1, 4 * Hp)


def pack_params(w_ih, w_hh, b_ih, b_hh, w_fc, b_fc):
    """Pack weights once at model-load time (gate reorder, transpose, pad, bf16 cast).
    Only the per-call input transpose/pad of x stays inside the jitted forward."""
    D = w_ih.shape[1]
    H = w_hh.shape[1]
    O = w_fc.shape[0]
    Dp, Hp, Op = _round_up(D, LANE), _round_up(H, LANE), _round_up(O, LANE)

    wih_p = _pack_gates(w_ih.astype(jnp.float32), Dp, Hp).astype(jnp.bfloat16)   # (Dp, 4Hp)
    whh_p = _pack_gates(w_hh.astype(jnp.float32), Hp, Hp).astype(jnp.bfloat16)   # (Hp, 4Hp)
    bias_p = _pack_bias((b_ih + b_hh).astype(jnp.float32), H, Hp)                # (1, 4Hp) f32
    wfc_p = _pad2(w_fc.T.astype(jnp.float32), Hp, Op).astype(jnp.bfloat16)       # (Hp, Op)
    bfc_p = jnp.pad(b_fc.astype(jnp.float32), (0, Op - O)).reshape(1, Op)        # (1, Op) f32
    return (wih_p, whh_p, bias_p, wfc_p, bfc_p), O


# ------------------------------------ forward -----------------------------------------
@functools.partial(jax.jit, static_argnames=("out_dim",))
def lstm_forward(x, wih_p, whh_p, bias_p, wfc_p, bfc_p, out_dim):
    """x: (B, S, D) f32; packed weights from pack_params().
    Returns (B, out_dim) f32. Matches torch nn.LSTM(batch_first=True) + nn.Linear."""
    B, S, D = x.shape
    Dp = wih_p.shape[0]
    Hp = whh_p.shape[0]
    Op = wfc_p.shape[1]

    # Per-call input prep only: time-major, pad feature dim to a full lane tile, bf16.
    x_sbd = jnp.transpose(x, (1, 0, 2)).astype(jnp.float32)                  # (S, B, D)
    x_pad = jnp.pad(x_sbd, ((0, 0), (0, 0), (0, Dp - D))).astype(jnp.bfloat16)

    out_pad = pl.pallas_call(
        lstm_kernel,
        out_shape=jax.ShapeDtypeStruct((B, Op), jnp.float32),
        grid_spec=pltpu.PrefetchScalarGridSpec(
            num_scalar_prefetch=0,
            grid=(1,),
            in_specs=[
                pl.BlockSpec((S, B, Dp), lambda i: (0, 0, 0)),       # x (full, bf16)
                pl.BlockSpec((Dp, 4 * Hp), lambda i: (0, 0)),        # W_ih^T packed
                pl.BlockSpec((Hp, 4 * Hp), lambda i: (0, 0)),        # W_hh^T packed
                pl.BlockSpec((1, 4 * Hp), lambda i: (0, 0)),         # fused bias
                pl.BlockSpec((Hp, Op), lambda i: (0, 0)),            # W_fc^T
                pl.BlockSpec((1, Op), lambda i: (0, 0)),             # b_fc
            ],
            out_specs=pl.BlockSpec((B, Op), lambda i: (0, 0)),
        ),
        compiler_params=pltpu.CompilerParams(
            dimension_semantics=("arbitrary",)),                     # recurrent -> sequential
    )(x_pad, wih_p, whh_p, bias_p, wfc_p, bfc_p)

    return out_pad[:, :out_dim]


# ------------------------------------ reference ---------------------------------------
def reference_forward(x, w_ih, w_hh, b_ih, b_hh, w_fc, b_fc,
                      matmul_dtype=jnp.float32):
    """Pure-JAX reference matching torch.nn.LSTM + Linear semantics.

    With matmul_dtype=bfloat16 it mimics the kernel's quantization (bf16 matmul inputs,
    f32 accumulate / elementwise), isolating kernel bugs from quantization error."""
    B = x.shape[0]
    H = w_hh.shape[1]
    cast = lambda a: a.astype(matmul_dtype).astype(jnp.float32)
    w_ih_c, w_hh_c, w_fc_c = cast(w_ih), cast(w_hh), cast(w_fc)

    def step(carry, x_t):
        h, c = carry
        gates = cast(x_t) @ w_ih_c.T + cast(h) @ w_hh_c.T + b_ih + b_hh
        i = jax.nn.sigmoid(gates[:, 0:H])
        f = jax.nn.sigmoid(gates[:, H:2 * H])
        g = jnp.tanh(gates[:, 2 * H:3 * H])
        o = jax.nn.sigmoid(gates[:, 3 * H:4 * H])
        c = f * c + i * g
        h = o * jnp.tanh(c)
        return (h, c), None

    h0 = jnp.zeros((B, H), jnp.float32)
    c0 = jnp.zeros((B, H), jnp.float32)
    (h_last, _), _ = jax.lax.scan(step, (h0, c0), jnp.transpose(x, (1, 0, 2)))
    return cast(h_last) @ w_fc_c.T + b_fc


if __name__ == "__main__":
    B, S, D, H, O = 8, 8, INPUT_DIM, HIDDEN_DIM, OUTPUT_DIM

    key = jax.random.PRNGKey(0)
    k_x, k_wih, k_whh, k_bih, k_bhh, k_wfc, k_bfc = jax.random.split(key, 7)

    # PyTorch-style init: uniform(-1/sqrt(H), 1/sqrt(H)).
    lim = 1.0 / jnp.sqrt(jnp.float32(H))
    x = jax.random.normal(k_x, (B, S, D), jnp.float32)
    w_ih = jax.random.uniform(k_wih, (4 * H, D), jnp.float32, -lim, lim)
    w_hh = jax.random.uniform(k_whh, (4 * H, H), jnp.float32, -lim, lim)
    b_ih = jax.random.uniform(k_bih, (4 * H,), jnp.float32, -lim, lim)
    b_hh = jax.random.uniform(k_bhh, (4 * H,), jnp.float32, -lim, lim)
    w_fc = jax.random.uniform(k_wfc, (O, H), jnp.float32, -lim, lim)
    b_fc = jax.random.uniform(k_bfc, (O,), jnp.float32, -lim, lim)

    # One-time packing (outside the per-call jitted path).
    packed, out_dim = pack_params(w_ih, w_hh, b_ih, b_hh, w_fc, b_fc)
    packed = jax.tree_util.tree_map(jax.block_until_ready, packed)

    out = jax.block_until_ready(lstm_forward(x, *packed, out_dim=out_dim))
    assert out.shape == (B, O)

    # Tight check vs a reference with identical bf16 matmul-input quantization
    # (catches any kernel bug: gate order, padding leakage, hoisted projection, etc.).
    ref_q = reference_forward(x, w_ih, w_hh, b_ih, b_hh, w_fc, b_fc,
                              matmul_dtype=jnp.bfloat16)
    assert jnp.allclose(out, ref_q, atol=1e-3, rtol=1e-3), "mismatch vs bf16-matched reference"

    # Semantic sanity vs full-f32 LSTM+Linear (difference is only bf16 MXU-input rounding).
    ref = reference_forward(x, w_ih, w_hh, b_ih, b_hh, w_fc, b_fc,
                            matmul_dtype=jnp.float32)
    assert jnp.allclose(out, ref, atol=2e-2, rtol=2e-2), "mismatch vs f32 reference"

    print("KERNEL_OK")
</pallas_src>

<mosaic_0001>
module attributes {stable_mosaic.version = 11 : i64} {
  func.func @lstm_kernel(%arg0: i32, %arg1: memref<8x8x128xbf16, #tpu.memory_space<vmem>>, %arg2: memref<128x512xbf16, #tpu.memory_space<vmem>>, %arg3: memref<128x512xbf16, #tpu.memory_space<vmem>>, %arg4: memref<1x512xf32, #tpu.memory_space<vmem>>, %arg5: memref<128x128xbf16, #tpu.memory_space<vmem>>, %arg6: memref<1x128xf32, #tpu.memory_space<vmem>>, %arg7: memref<8x128xf32, #tpu.memory_space<vmem>>) attributes {dimension_semantics = [#tpu.dimension_semantics<arbitrary>], iteration_bounds = array<i64: 1>, scalar_prefetch = 0 : i64, scratch_operands = 0 : i64, tpu.core_type = #tpu.core_type<tc>, window_params = [{pipeline_mode = #tpu.pipeline_mode<synchronous>, transform_indices = @transform_0, window_bounds = array<i64: 8, 8, 128>}, {pipeline_mode = #tpu.pipeline_mode<synchronous>, transform_indices = @transform_1, window_bounds = array<i64: 128, 512>}, {pipeline_mode = #tpu.pipeline_mode<synchronous>, transform_indices = @transform_2, window_bounds = array<i64: 128, 512>}, {pipeline_mode = #tpu.pipeline_mode<synchronous>, transform_indices = @transform_3, window_bounds = array<i64: 1, 512>}, {pipeline_mode = #tpu.pipeline_mode<synchronous>, transform_indices = @transform_4, window_bounds = array<i64: 128, 128>}, {pipeline_mode = #tpu.pipeline_mode<synchronous>, transform_indices = @transform_5, window_bounds = array<i64: 1, 128>}, {pipeline_mode = #tpu.pipeline_mode<synchronous>, transform_indices = @transform_6, window_bounds = array<i64: 8, 128>}]} {
    %c0 = arith.constant 0 : index
    %c0_0 = arith.constant 0 : index
    %c0_1 = arith.constant 0 : index
    %0 = vector.load %arg1[%c0, %c0_0, %c0_1] : memref<8x8x128xbf16, #tpu.memory_space<vmem>>, vector<8x8x128xbf16>
    %1 = vector.shape_cast %0 : vector<8x8x128xbf16> to vector<64x128xbf16>
    %c0_2 = arith.constant 0 : index
    %c0_3 = arith.constant 0 : index
    %2 = vector.load %arg2[%c0_2, %c0_3] : memref<128x512xbf16, #tpu.memory_space<vmem>>, vector<128x512xbf16>
    %cst = arith.constant dense<0.000000e+00> : vector<64x512xf32>
    %3 = tpu.matmul %1, %2, %cst {dimension_numbers = #tpu.dot_dimension_numbers<[1], [0], [0], [1], [0, 0, 1, 1], [], []>} : vector<64x128xbf16>, vector<128x512xbf16>, vector<64x512xf32> -> vector<64x512xf32>
    %c0_4 = arith.constant 0 : index
    %c0_5 = arith.constant 0 : index
    %4 = vector.load %arg4[%c0_4, %c0_5] : memref<1x512xf32, #tpu.memory_space<vmem>>, vector<1x512xf32>
    %5 = vector.broadcast %4 : vector<1x512xf32> to vector<64x512xf32>
    %6 = arith.addf %3, %5 : vector<64x512xf32>
    %c0_6 = arith.constant 0 : index
    %c0_7 = arith.constant 0 : index
    %7 = vector.load %arg3[%c0_6, %c0_7] : memref<128x512xbf16, #tpu.memory_space<vmem>>, vector<128x512xbf16>
    %cst_8 = arith.constant 0.000000e+00 : f32
    %8 = vector.broadcast %cst_8 : f32 to vector<8x128xf32>
    %cst_9 = arith.constant 0.000000e+00 : f32
    %9 = vector.broadcast %cst_9 : f32 to vector<8x128xf32>
    %10 = vector.extract_strided_slice %6 {offsets = [0, 0], sizes = [8, 512], strides = [1, 1]} : vector<64x512xf32> to vector<8x512xf32>
    %11 = arith.truncf %8 : vector<8x128xf32> to vector<8x128xbf16>
    %cst_10 = arith.constant dense<0.000000e+00> : vector<8x512xf32>
    %12 = tpu.matmul %11, %7, %cst_10 {dimension_numbers = #tpu.dot_dimension_numbers<[1], [0], [0], [1], [0, 0, 1, 1], [], []>} : vector<8x128xbf16>, vector<128x512xbf16>, vector<8x512xf32> -> vector<8x512xf32>
    %13 = arith.addf %10, %12 : vector<8x512xf32>
    %14 = vector.extract_strided_slice %13 {offsets = [0, 0], sizes = [8, 384], strides = [1, 1]} : vector<8x512xf32> to vector<8x384xf32>
    %15 = arith.negf %14 : vector<8x384xf32>
    %16 = math.exp %15 : vector<8x384xf32>
    %cst_11 = arith.constant 1.000000e+00 : f32
    %17 = vector.broadcast %cst_11 : f32 to vector<8x384xf32>
    %18 = arith.addf %17, %16 : vector<8x384xf32>
    %19 = arith.divf %17, %18 : vector<8x384xf32>
    %20 = vector.extract_strided_slice %13 {offsets = [0, 384], sizes = [8, 128], strides = [1, 1]} : vector<8x512xf32> to vector<8x128xf32>
    %21 = math.tanh %20 : vector<8x128xf32>
    %22 = vector.extract_strided_slice %19 {offsets = [0, 0], sizes = [8, 128], strides = [1, 1]} : vector<8x384xf32> to vector<8x128xf32>
    %23 = vector.extract_strided_slice %19 {offsets = [0, 128], sizes = [8, 128], strides = [1, 1]} : vector<8x384xf32> to vector<8x128xf32>
    %24 = vector.extract_strided_slice %19 {offsets = [0, 256], sizes = [8, 128], strides = [1, 1]} : vector<8x384xf32> to vector<8x128xf32>
    %25 = arith.mulf %23, %9 : vector<8x128xf32>
    %26 = arith.mulf %22, %21 : vector<8x128xf32>
    %27 = arith.addf %25, %26 : vector<8x128xf32>
    %28 = math.tanh %27 : vector<8x128xf32>
    %29 = arith.mulf %24, %28 : vector<8x128xf32>
    %30 = vector.extract_strided_slice %6 {offsets = [8, 0], sizes = [8, 512], strides = [1, 1]} : vector<64x512xf32> to vector<8x512xf32>
    %31 = arith.truncf %29 : vector<8x128xf32> to vector<8x128xbf16>
    %cst_12 = arith.constant dense<0.000000e+00> : vector<8x512xf32>
    %32 = tpu.matmul %31, %7, %cst_12 {dimension_numbers = #tpu.dot_dimension_numbers<[1], [0], [0], [1], [0, 0, 1, 1], [], []>} : vector<8x128xbf16>, vector<128x512xbf16>, vector<8x512xf32> -> vector<8x512xf32>
    %33 = arith.addf %30, %32 : vector<8x512xf32>
    %34 = vector.extract_strided_slice %33 {offsets = [0, 0], sizes = [8, 384], strides = [1, 1]} : vector<8x512xf32> to vector<8x384xf32>
    %35 = arith.negf %34 : vector<8x384xf32>
    %36 = math.exp %35 : vector<8x384xf32>
    %cst_13 = arith.constant 1.000000e+00 : f32
    %37 = vector.broadcast %cst_13 : f32 to vector<8x384xf32>
    %38 = arith.addf %37, %36 : vector<8x384xf32>
    %39 = arith.divf %37, %38 : vector<8x384xf32>
    %40 = vector.extract_strided_slice %33 {offsets = [0, 384], sizes = [8, 128], strides = [1, 1]} : vector<8x512xf32> to vector<8x128xf32>
    %41 = math.tanh %40 : vector<8x128xf32>
    %42 = vector.extract_strided_slice %39 {offsets = [0, 0], sizes = [8, 128], strides = [1, 1]} : vector<8x384xf32> to vector<8x128xf32>
    %43 = vector.extract_strided_slice %39 {offsets = [0, 128], sizes = [8, 128], strides = [1, 1]} : vector<8x384xf32> to vector<8x128xf32>
    %44 = vector.extract_strided_slice %39 {offsets = [0, 256], sizes = [8, 128], strides = [1, 1]} : vector<8x384xf32> to vector<8x128xf32>
    %45 = arith.mulf %43, %27 : vector<8x128xf32>
    %46 = arith.mulf %42, %41 : vector<8x128xf32>
    %47 = arith.addf %45, %46 : vector<8x128xf32>
    %48 = math.tanh %47 : vector<8x128xf32>
    %49 = arith.mulf %44, %48 : vector<8x128xf32>
    %50 = vector.extract_strided_slice %6 {offsets = [16, 0], sizes = [8, 512], strides = [1, 1]} : vector<64x512xf32> to vector<8x512xf32>
    %51 = arith.truncf %49 : vector<8x128xf32> to vector<8x128xbf16>
    %cst_14 = arith.constant dense<0.000000e+00> : vector<8x512xf32>
    %52 = tpu.matmul %51, %7, %cst_14 {dimension_numbers = #tpu.dot_dimension_numbers<[1], [0], [0], [1], [0, 0, 1, 1], [], []>} : vector<8x128xbf16>, vector<128x512xbf16>, vector<8x512xf32> -> vector<8x512xf32>
    %53 = arith.addf %50, %52 : vector<8x512xf32>
    %54 = vector.extract_strided_slice %53 {offsets = [0, 0], sizes = [8, 384], strides = [1, 1]} : vector<8x512xf32> to vector<8x384xf32>
    %55 = arith.negf %54 : vector<8x384xf32>
    %56 = math.exp %55 : vector<8x384xf32>
    %cst_15 = arith.constant 1.000000e+00 : f32
    %57 = vector.broadcast %cst_15 : f32 to vector<8x384xf32>
    %58 = arith.addf %57, %56 : vector<8x384xf32>
    %59 = arith.divf %57, %58 : vector<8x384xf32>
    %60 = vector.extract_strided_slice %53 {offsets = [0, 384], sizes = [8, 128], strides = [1, 1]} : vector<8x512xf32> to vector<8x128xf32>
    %61 = math.tanh %60 : vector<8x128xf32>
    %62 = vector.extract_strided_slice %59 {offsets = [0, 0], sizes = [8, 128], strides = [1, 1]} : vector<8x384xf32> to vector<8x128xf32>
    %63 = vector.extract_strided_slice %59 {offsets = [0, 128], sizes = [8, 128], strides = [1, 1]} : vector<8x384xf32> to vector<8x128xf32>
    %64 = vector.extract_strided_slice %59 {offsets = [0, 256], sizes = [8, 128], strides = [1, 1]} : vector<8x384xf32> to vector<8x128xf32>
    %65 = arith.mulf %63, %47 : vector<8x128xf32>
    %66 = arith.mulf %62, %61 : vector<8x128xf32>
    %67 = arith.addf %65, %66 : vector<8x128xf32>
    %68 = math.tanh %67 : vector<8x128xf32>
    %69 = arith.mulf %64, %68 : vector<8x128xf32>
    %70 = vector.extract_strided_slice %6 {offsets = [24, 0], sizes = [8, 512], strides = [1, 1]} : vector<64x512xf32> to vector<8x512xf32>
    %71 = arith.truncf %69 : vector<8x128xf32> to vector<8x128xbf16>
    %cst_16 = arith.constant dense<0.000000e+00> : vector<8x512xf32>
    %72 = tpu.matmul %71, %7, %cst_16 {dimension_numbers = #tpu.dot_dimension_numbers<[1], [0], [0], [1], [0, 0, 1, 1], [], []>} : vector<8x128xbf16>, vector<128x512xbf16>, vector<8x512xf32> -> vector<8x512xf32>
    %73 = arith.addf %70, %72 : vector<8x512xf32>
    %74 = vector.extract_strided_slice %73 {offsets = [0, 0], sizes = [8, 384], strides = [1, 1]} : vector<8x512xf32> to vector<8x384xf32>
    %75 = arith.negf %74 : vector<8x384xf32>
    %76 = math.exp %75 : vector<8x384xf32>
    %cst_17 = arith.constant 1.000000e+00 : f32
    %77 = vector.broadcast %cst_17 : f32 to vector<8x384xf32>
    %78 = arith.addf %77, %76 : vector<8x384xf32>
    %79 = arith.divf %77, %78 : vector<8x384xf32>
    %80 = vector.extract_strided_slice %73 {offsets = [0, 384], sizes = [8, 128], strides = [1, 1]} : vector<8x512xf32> to vector<8x128xf32>
    %81 = math.tanh %80 : vector<8x128xf32>
    %82 = vector.extract_strided_slice %79 {offsets = [0, 0], sizes = [8, 128], strides = [1, 1]} : vector<8x384xf32> to vector<8x128xf32>
    %83 = vector.extract_strided_slice %79 {offsets = [0, 128], sizes = [8, 128], strides = [1, 1]} : vector<8x384xf32> to vector<8x128xf32>
    %84 = vector.extract_strided_slice %79 {offsets = [0, 256], sizes = [8, 128], strides = [1, 1]} : vector<8x384xf32> to vector<8x128xf32>
    %85 = arith.mulf %83, %67 : vector<8x128xf32>
    %86 = arith.mulf %82, %81 : vector<8x128xf32>
    %87 = arith.addf %85, %86 : vector<8x128xf32>
    %88 = math.tanh %87 : vector<8x128xf32>
    %89 = arith.mulf %84, %88 : vector<8x128xf32>
    %90 = vector.extract_strided_slice %6 {offsets = [32, 0], sizes = [8, 512], strides = [1, 1]} : vector<64x512xf32> to vector<8x512xf32>
    %91 = arith.truncf %89 : vector<8x128xf32> to vector<8x128xbf16>
    %cst_18 = arith.constant dense<0.000000e+00> : vector<8x512xf32>
    %92 = tpu.matmul %91, %7, %cst_18 {dimension_numbers = #tpu.dot_dimension_numbers<[1], [0], [0], [1], [0, 0, 1, 1], [], []>} : vector<8x128xbf16>, vector<128x512xbf16>, vector<8x512xf32> -> vector<8x512xf32>
    %93 = arith.addf %90, %92 : vector<8x512xf32>
    %94 = vector.extract_strided_slice %93 {offsets = [0, 0], sizes = [8, 384], strides = [1, 1]} : vector<8x512xf32> to vector<8x384xf32>
    %95 = arith.negf %94 : vector<8x384xf32>
    %96 = math.exp %95 : vector<8x384xf32>
    %cst_19 = arith.constant 1.000000e+00 : f32
    %97 = vector.broadcast %cst_19 : f32 to vector<8x384xf32>
    %98 = arith.addf %97, %96 : vector<8x384xf32>
    %99 = arith.divf %97, %98 : vector<8x384xf32>
    %100 = vector.extract_strided_slice %93 {offsets = [0, 384], sizes = [8, 128], strides = [1, 1]} : vector<8x512xf32> to vector<8x128xf32>
    %101 = math.tanh %100 : vector<8x128xf32>
    %102 = vector.extract_strided_slice %99 {offsets = [0, 0], sizes = [8, 128], strides = [1, 1]} : vector<8x384xf32> to vector<8x128xf32>
    %103 = vector.extract_strided_slice %99 {offsets = [0, 128], sizes = [8, 128], strides = [1, 1]} : vector<8x384xf32> to vector<8x128xf32>
    %104 = vector.extract_strided_slice %99 {offsets = [0, 256], sizes = [8, 128], strides = [1, 1]} : vector<8x384xf32> to vector<8x128xf32>
    %105 = arith.mulf %103, %87 : vector<8x128xf32>
    %106 = arith.mulf %102, %101 : vector<8x128xf32>
    %107 = arith.addf %105, %106 : vector<8x128xf32>
    %108 = math.tanh %107 : vector<8x128xf32>
    %109 = arith.mulf %104, %108 : vector<8x128xf32>
    %110 = vector.extract_strided_slice %6 {offsets = [40, 0], sizes = [8, 512], strides = [1, 1]} : vector<64x512xf32> to vector<8x512xf32>
    %111 = arith.truncf %109 : vector<8x128xf32> to vector<8x128xbf16>
    %cst_20 = arith.constant dense<0.000000e+00> : vector<8x512xf32>
    %112 = tpu.matmul %111, %7, %cst_20 {dimension_numbers = #tpu.dot_dimension_numbers<[1], [0], [0], [1], [0, 0, 1, 1], [], []>} : vector<8x128xbf16>, vector<128x512xbf16>, vector<8x512xf32> -> vector<8x512xf32>
    %113 = arith.addf %110, %112 : vector<8x512xf32>
    %114 = vector.extract_strided_slice %113 {offsets = [0, 0], sizes = [8, 384], strides = [1, 1]} : vector<8x512xf32> to vector<8x384xf32>
    %115 = arith.negf %114 : vector<8x384xf32>
    %116 = math.exp %115 : vector<8x384xf32>
    %cst_21 = arith.constant 1.000000e+00 : f32
    %117 = vector.broadcast %cst_21 : f32 to vector<8x384xf32>
    %118 = arith.addf %117, %116 : vector<8x384xf32>
    %119 = arith.divf %117, %118 : vector<8x384xf32>
    %120 = vector.extract_strided_slice %113 {offsets = [0, 384], sizes = [8, 128], strides = [1, 1]} : vector<8x512xf32> to vector<8x128xf32>
    %121 = math.tanh %120 : vector<8x128xf32>
    %122 = vector.extract_strided_slice %119 {offsets = [0, 0], sizes = [8, 128], strides = [1, 1]} : vector<8x384xf32> to vector<8x128xf32>
    %123 = vector.extract_strided_slice %119 {offsets = [0, 128], sizes = [8, 128], strides = [1, 1]} : vector<8x384xf32> to vector<8x128xf32>
    %124 = vector.extract_strided_slice %119 {offsets = [0, 256], sizes = [8, 128], strides = [1, 1]} : vector<8x384xf32> to vector<8x128xf32>
    %125 = arith.mulf %123, %107 : vector<8x128xf32>
    %126 = arith.mulf %122, %121 : vector<8x128xf32>
    %127 = arith.addf %125, %126 : vector<8x128xf32>
    %128 = math.tanh %127 : vector<8x128xf32>
    %129 = arith.mulf %124, %128 : vector<8x128xf32>
    %130 = vector.extract_strided_slice %6 {offsets = [48, 0], sizes = [8, 512], strides = [1, 1]} : vector<64x512xf32> to vector<8x512xf32>
    %131 = arith.truncf %129 : vector<8x128xf32> to vector<8x128xbf16>
    %cst_22 = arith.constant dense<0.000000e+00> : vector<8x512xf32>
    %132 = tpu.matmul %131, %7, %cst_22 {dimension_numbers = #tpu.dot_dimension_numbers<[1], [0], [0], [1], [0, 0, 1, 1], [], []>} : vector<8x128xbf16>, vector<128x512xbf16>, vector<8x512xf32> -> vector<8x512xf32>
    %133 = arith.addf %130, %132 : vector<8x512xf32>
    %134 = vector.extract_strided_slice %133 {offsets = [0, 0], sizes = [8, 384], strides = [1, 1]} : vector<8x512xf32> to vector<8x384xf32>
    %135 = arith.negf %134 : vector<8x384xf32>
    %136 = math.exp %135 : vector<8x384xf32>
    %cst_23 = arith.constant 1.000000e+00 : f32
    %137 = vector.broadcast %cst_23 : f32 to vector<8x384xf32>
    %138 = arith.addf %137, %136 : vector<8x384xf32>
    %139 = arith.divf %137, %138 : vector<8x384xf32>
    %140 = vector.extract_strided_slice %133 {offsets = [0, 384], sizes = [8, 128], strides = [1, 1]} : vector<8x512xf32> to vector<8x128xf32>
    %141 = math.tanh %140 : vector<8x128xf32>
    %142 = vector.extract_strided_slice %139 {offsets = [0, 0], sizes = [8, 128], strides = [1, 1]} : vector<8x384xf32> to vector<8x128xf32>
    %143 = vector.extract_strided_slice %139 {offsets = [0, 128], sizes = [8, 128], strides = [1, 1]} : vector<8x384xf32> to vector<8x128xf32>
    %144 = vector.extract_strided_slice %139 {offsets = [0, 256], sizes = [8, 128], strides = [1, 1]} : vector<8x384xf32> to vector<8x128xf32>
    %145 = arith.mulf %143, %127 : vector<8x128xf32>
    %146 = arith.mulf %142, %141 : vector<8x128xf32>
    %147 = arith.addf %145, %146 : vector<8x128xf32>
    %148 = math.tanh %147 : vector<8x128xf32>
    %149 = arith.mulf %144, %148 : vector<8x128xf32>
    %150 = vector.extract_strided_slice %6 {offsets = [56, 0], sizes = [8, 512], strides = [1, 1]} : vector<64x512xf32> to vector<8x512xf32>
    %151 = arith.truncf %149 : vector<8x128xf32> to vector<8x128xbf16>
    %cst_24 = arith.constant dense<0.000000e+00> : vector<8x512xf32>
    %152 = tpu.matmul %151, %7, %cst_24 {dimension_numbers = #tpu.dot_dimension_numbers<[1], [0], [0], [1], [0, 0, 1, 1], [], []>} : vector<8x128xbf16>, vector<128x512xbf16>, vector<8x512xf32> -> vector<8x512xf32>
    %153 = arith.addf %150, %152 : vector<8x512xf32>
    %154 = vector.extract_strided_slice %153 {offsets = [0, 0], sizes = [8, 384], strides = [1, 1]} : vector<8x512xf32> to vector<8x384xf32>
    %155 = arith.negf %154 : vector<8x384xf32>
    %156 = math.exp %155 : vector<8x384xf32>
    %cst_25 = arith.constant 1.000000e+00 : f32
    %157 = vector.broadcast %cst_25 : f32 to vector<8x384xf32>
    %158 = arith.addf %157, %156 : vector<8x384xf32>
    %159 = arith.divf %157, %158 : vector<8x384xf32>
    %160 = vector.extract_strided_slice %153 {offsets = [0, 384], sizes = [8, 128], strides = [1, 1]} : vector<8x512xf32> to vector<8x128xf32>
    %161 = math.tanh %160 : vector<8x128xf32>
    %162 = vector.extract_strided_slice %159 {offsets = [0, 0], sizes = [8, 128], strides = [1, 1]} : vector<8x384xf32> to vector<8x128xf32>
    %163 = vector.extract_strided_slice %159 {offsets = [0, 128], sizes = [8, 128], strides = [1, 1]} : vector<8x384xf32> to vector<8x128xf32>
    %164 = vector.extract_strided_slice %159 {offsets = [0, 256], sizes = [8, 128], strides = [1, 1]} : vector<8x384xf32> to vector<8x128xf32>
    %165 = arith.mulf %163, %147 : vector<8x128xf32>
    %166 = arith.mulf %162, %161 : vector<8x128xf32>
    %167 = arith.addf %165, %166 : vector<8x128xf32>
    %168 = math.tanh %167 : vector<8x128xf32>
    %169 = arith.mulf %164, %168 : vector<8x128xf32>
    %170 = arith.truncf %169 : vector<8x128xf32> to vector<8x128xbf16>
    %c0_26 = arith.constant 0 : index
    %c0_27 = arith.constant 0 : index
    %171 = vector.load %arg5[%c0_26, %c0_27] : memref<128x128xbf16, #tpu.memory_space<vmem>>, vector<128x128xbf16>
    %cst_28 = arith.constant dense<0.000000e+00> : vector<8x128xf32>
    %172 = tpu.matmul %170, %171, %cst_28 {dimension_numbers = #tpu.dot_dimension_numbers<[1], [0], [0], [1], [0, 0, 1, 1], [], []>} : vector<8x128xbf16>, vector<128x128xbf16>, vector<8x128xf32> -> vector<8x128xf32>
    %c0_29 = arith.constant 0 : index
    %c0_30 = arith.constant 0 : index
    %173 = vector.load %arg6[%c0_29, %c0_30] : memref<1x128xf32, #tpu.memory_space<vmem>>, vector<1x128xf32>
    %174 = vector.broadcast %173 : vector<1x128xf32> to vector<8x128xf32>
    %175 = arith.addf %172, %174 : vector<8x128xf32>
    %c0_31 = arith.constant 0 : index
    %c0_32 = arith.constant 0 : index
    %176 = vector.load %arg7[%c0_31, %c0_32] : memref<8x128xf32, #tpu.memory_space<vmem>>, vector<8x128xf32>
    tpu.vector_store %arg7[%c0_31, %c0_32], %175 {strides = array<i32>} : memref<8x128xf32, #tpu.memory_space<vmem>>, vector<8x128xf32>,
    return
  }
  func.func @transform_0(%arg0: i32) -> (i32, i32, i32) {
    %c0_i32 = arith.constant 0 : i32
    %c0_i32_0 = arith.constant 0 : i32
    %c0_i32_1 = arith.constant 0 : i32
    %c0_i32_2 = arith.constant 0 : i32
    return %c0_i32, %c0_i32_0, %c0_i32_1 : i32, i32, i32
  }
  func.func @transform_1(%arg0: i32) -> (i32, i32) {
    %c0_i32 = arith.constant 0 : i32
    %c0_i32_0 = arith.constant 0 : i32
    %c0_i32_1 = arith.constant 0 : i32
    return %c0_i32, %c0_i32_0 : i32, i32
  }
  func.func @transform_2(%arg0: i32) -> (i32, i32) {
    %c0_i32 = arith.constant 0 : i32
    %c0_i32_0 = arith.constant 0 : i32
    %c0_i32_1 = arith.constant 0 : i32
    return %c0_i32, %c0_i32_0 : i32, i32
  }
  func.func @transform_3(%arg0: i32) -> (i32, i32) {
    %c0_i32 = arith.constant 0 : i32
    %c0_i32_0 = arith.constant 0 : i32
    %c0_i32_1 = arith.constant 0 : i32
    return %c0_i32, %c0_i32_0 : i32, i32
  }
  func.func @transform_4(%arg0: i32) -> (i32, i32) {
    %c0_i32 = arith.constant 0 : i32
    %c0_i32_0 = arith.constant 0 : i32
    %c0_i32_1 = arith.constant 0 : i32
    return %c0_i32, %c0_i32_0 : i32, i32
  }
  func.func @transform_5(%arg0: i32) -> (i32, i32) {
    %c0_i32 = arith.constant 0 : i32
    %c0_i32_0 = arith.constant 0 : i32
    %c0_i32_1 = arith.constant 0 : i32
    return %c0_i32, %c0_i32_0 : i32, i32
  }
  func.func @transform_6(%arg0: i32) -> (i32, i32) {
    %c0_i32 = arith.constant 0 : i32
    %c0_i32_0 = arith.constant 0 : i32
    %c0_i32_1 = arith.constant 0 : i32
    return %c0_i32, %c0_i32_0 : i32, i32
  }
}

</mosaic_0001>

<bundles_post_ra>
// kernel: lstm_forward.1
= control target key start
LH: loop header
LB: loop body
LE: loop exit
PB: predicated region body
PF: predicated region fallthrough
CT: control target
= control target key end

     0   :  { %11 = vsyncpa [#allocation3], 0  ;;  %s2836_s0 = inlined_call_operand.vmem [shape: bf16[8,8,128], index: 0, kind: input, shape index: {}]   ;;  %s2837_s1 = inlined_call_operand.hbm [shape: bf16[128,512], index: 1, kind: input, shape index: {}]   ;;  %s2838_s2 = inlined_call_operand.hbm [shape: bf16[128,512], index: 2, kind: input, shape index: {}]   ;;  %s2839_s3 = inlined_call_operand.vmem [shape: f32[1,512], index: 3, kind: input, shape index: {}]   ;;  %s2840_s4 = inlined_call_operand.vmem [shape: bf16[128,128], index: 4, kind: input, shape index: {}]   ;;  %s2841_s5 = inlined_call_operand.vmem [shape: f32[1,128], index: 5, kind: input, shape index: {}]   ;;  %s2842_s6 = inlined_call_operand.hbm [shape: f32[8,128], index: 6, kind: output, shape index: {}]  }
   0x1   :  { %12 = vsyncpa [#allocation6], 0 }
   0x2   :  { %13 = vsyncpa [#allocation4], 0  ;;  %s20_s23 = sshll.u32 %s2837_s1, 4  ;;  %s2276_s24 = smov [#allocation2]   ;;  %s21_s23 = int_to_ptr.hbm [resolvable:$true] %s20_s23 }
   0x3   :  { %s22_s25 = sshll.u32 %s2276_s24, 4  ;;  %s33_s28 = sshll.u32 %s2838_s2, 4  ;;  %s23_s25 = int_to_ptr.vmem [resolvable:$true] %s22_s25  ;;  %s34_s28 = int_to_ptr.hbm [resolvable:$true] %s33_s28 }
   0x4   :  { %s2277_s29 = smov 256   ;;  %s2278_s30 = smov 16  }
   0x5   :  { %28 = dma.hbm_to_vmem [thread:$0]  %s21_s23, 4096, %s23_s25, [#allocation3], %s2277_s29, %s2277_s29, %s2278_s30  }
   0x6   :  { %s2279_s7 = smov [#allocation5]  }
   0x7   :  { %s35_s8 = sshll.u32 %s2279_s7, 4  ;;  %s36_s8 = int_to_ptr.vmem [resolvable:$true] %s35_s8 }
   0x8   :  { %41 = dma.hbm_to_vmem [thread:$0]  %s34_s28, 4096, %s36_s8, [#allocation6], %s2277_s29, %s2277_s29, %s2278_s30  }
   0x9   :  { %2270 = dma.done.wait [#allocation3], 4096  }
   0xa   :  { %2271 = vsyncadd [#allocation3], 4294963200 }
   0xb   :  { %2272 = dma.done.wait [#allocation6], 4096  }
   0xc   :  { %2273 = vsyncadd [#allocation6], 4294963200  ;;  %v1789_v0 = vld [vmem:[#allocation2 + $0xe0] sm:$0xf]  ;;  %v2021_v1 = vld [vmem:[#allocation2 + $0xec] sm:$0xf0] }
   0xd   :  { %v2019_v2 = vld [vmem:[#allocation2 + $0xe4] sm:$0xf]  ;;  %v1790_v3 = vor.u32 %v2021_v1, %v1789_v0  ;;  %v1791_v4 = vld [vmem:[#allocation2 + $0xf0] sm:$0xf0]  ;;  %v1797_v5 = vld [vmem:[#allocation2 + $0xe8] sm:$0xf] }
   0xe   :  { %v2022_v6 = vld [vmem:[#allocation2 + $0xf4] sm:$0xf0]  ;;  %v1794_v7 = vor.u32 %v2019_v2, %v1791_v4  ;;  %v2020_v9 = vld [vmem:[#allocation2 + $0xec] sm:$0xf]  ;;  %v1799_v10 = vld [vmem:[#allocation2 + $0xf8] sm:$0xf0] }
   0xf   :  { %v1798_v8 = vor.u32 %v2022_v6, %v1797_v5  ;;  %v1773_v11 = vld [vmem:[#allocation2 + $0xc0] sm:$0xf]  ;;  %291 = vmatpush.bf16.msra.mxu0 %v1790_v3  ;;  %v1802_v12 = vor.u32 %v2020_v9, %v1799_v10  ;;  %v2017_v13 = vld [vmem:[#allocation2 + $0xcc] sm:$0xf0]  ;;  %v2015_v14 = vld [vmem:[#allocation2 + $0xc4] sm:$0xf] }
  0x10   :  { %v1775_v15 = vld [vmem:[#allocation2 + $0xd0] sm:$0xf0]  ;;  %320 = vmatpush.bf16.msra.mxu1 %v1794_v7  ;;  %v1774_v16 = vor.u32 %v2017_v13, %v1773_v11  ;;  %v1781_v18 = vld [vmem:[#allocation2 + $0xc8] sm:$0xf]  ;;  %v2018_v19 = vld [vmem:[#allocation2 + $0xd4] sm:$0xf0] }
  0x11   :  { %349 = vmatpush.bf16.msra.mxu2 %v1798_v8  ;;  %v1778_v17 = vor.u32 %v2015_v14, %v1775_v15  ;;  %v2016_v20 = vld [vmem:[#allocation2 + $0xcc] sm:$0xf]  ;;  %378 = vmatpush.bf16.msra.mxu3 %v1802_v12  ;;  %v1782_v21 = vor.u32 %v2018_v19, %v1781_v18  ;;  %v1783_v22 = vld [vmem:[#allocation2 + $0xd8] sm:$0xf0]  ;;  %v1757_v23 = vld [vmem:[#allocation2 + $0xa0] sm:$0xf] }
  0x12   :  { %v2013_v24 = vld [vmem:[#allocation2 + $0xac] sm:$0xf0]  ;;  %v1786_v25 = vor.u32 %v2016_v20, %v1783_v22  ;;  %v2011_v26 = vld [vmem:[#allocation2 + $0xa4] sm:$0xf]  ;;  %v1759_v27 = vld [vmem:[#allocation2 + $0xb0] sm:$0xf0] }
  0x13   :  { %v1765_v28 = vld [vmem:[#allocation2 + $0xa8] sm:$0xf]  ;;  %292 = vmatpush.bf16.msra.mxu0 %v1774_v16  ;;  %v1758_v29 = vor.u32 %v2013_v24, %v1757_v23  ;;  %v2014_v30 = vld [vmem:[#allocation2 + $0xb4] sm:$0xf0]  ;;  %v2012_v31 = vld [vmem:[#allocation2 + $0xac] sm:$0xf]  ;;  %v1762_v33 = vor.u32 %v2011_v26, %v1759_v27 }
  0x14   :  { %v1767_v32 = vld [vmem:[#allocation2 + $0xb8] sm:$0xf0]  ;;  %321 = vmatpush.bf16.msra.mxu1 %v1778_v17  ;;  %v1766_v34 = vor.u32 %v2014_v30, %v1765_v28  ;;  %v1741_v35 = vld [vmem:[#allocation2 + $0x80] sm:$0xf]  ;;  %v2009_v36 = vld [vmem:[#allocation2 + $0x8c] sm:$0xf0] }
  0x15   :  { %350 = vmatpush.bf16.msra.mxu2 %v1782_v21  ;;  %v2007_v37 = vld [vmem:[#allocation2 + $0x84] sm:$0xf]  ;;  %379 = vmatpush.bf16.msra.mxu3 %v1786_v25  ;;  %v1770_v38 = vor.u32 %v2012_v31, %v1767_v32  ;;  %v1743_v39 = vld [vmem:[#allocation2 + $0x90] sm:$0xf0]  ;;  %v1749_v40 = vld [vmem:[#allocation2 + $0x88] sm:$0xf]  ;;  %v1742_v44 = vor.u32 %v2009_v36, %v1741_v35 }
  0x16   :  { %v2010_v41 = vld [vmem:[#allocation2 + $0x94] sm:$0xf0]  ;;  %v2008_v42 = vld [vmem:[#allocation2 + $0x8c] sm:$0xf]  ;;  %v1751_v43 = vld [vmem:[#allocation2 + $0x98] sm:$0xf0]  ;;  %v1746_v45 = vor.u32 %v2007_v37, %v1743_v39 }
  0x17   :  { %293 = vmatpush.bf16.msra.mxu0 %v1758_v29  ;;  %v1750_v46 = vor.u32 %v2010_v41, %v1749_v40  ;;  %v1725_v47 = vld [vmem:[#allocation2 + $0x60] sm:$0xf]  ;;  %v2005_v48 = vld [vmem:[#allocation2 + $0x6c] sm:$0xf0]  ;;  %v2003_v49 = vld [vmem:[#allocation2 + $0x64] sm:$0xf]  ;;  %v1754_v50 = vor.u32 %v2008_v42, %v1751_v43 }
  0x18   :  { %322 = vmatpush.bf16.msra.mxu1 %v1762_v33  ;;  %v1727_v51 = vld [vmem:[#allocation2 + $0x70] sm:$0xf0]  ;;  %v1733_v52 = vld [vmem:[#allocation2 + $0x68] sm:$0xf]  ;;  %v2006_v53 = vld [vmem:[#allocation2 + $0x74] sm:$0xf0]  ;;  %v1726_v56 = vor.u32 %v2005_v48, %v1725_v47 }
  0x19   :  { %351 = vmatpush.bf16.msra.mxu2 %v1766_v34  ;;  %380 = vmatpush.bf16.msra.mxu3 %v1770_v38  ;;  %v2004_v54 = vld [vmem:[#allocation2 + $0x6c] sm:$0xf]  ;;  %v1735_v55 = vld [vmem:[#allocation2 + $0x78] sm:$0xf0]  ;;  %v1730_v57 = vor.u32 %v2003_v49, %v1727_v51  ;;  %v1734_v58 = vor.u32 %v2006_v53, %v1733_v52  ;;  %v1709_v59 = vld [vmem:[#allocation2 + $0x40] sm:$0xf] }
  0x1a   :  { %v2001_v60 = vld [vmem:[#allocation2 + $0x4c] sm:$0xf0]  ;;  %v1999_v61 = vld [vmem:[#allocation2 + $0x44] sm:$0xf]  ;;  %v1738_v62 = vor.u32 %v2004_v54, %v1735_v55  ;;  %v1711_v63 = vld [vmem:[#allocation2 + $0x50] sm:$0xf0] }
  0x1b   :  { %294 = vmatpush.bf16.msra.mxu0 %v1742_v44  ;;  %v1717_v0 = vld [vmem:[#allocation2 + $0x48] sm:$0xf]  ;;  %v2002_v1 = vld [vmem:[#allocation2 + $0x54] sm:$0xf0]  ;;  %v2000_v2 = vld [vmem:[#allocation2 + $0x4c] sm:$0xf]  ;;  %v1710_v4 = vor.u32 %v2001_v60, %v1709_v59  ;;  %v1714_v5 = vor.u32 %v1999_v61, %v1711_v63 }
  0x1c   :  { %323 = vmatpush.bf16.msra.mxu1 %v1746_v45  ;;  %v1719_v3 = vld [vmem:[#allocation2 + $0x58] sm:$0xf0]  ;;  %v1718_v6 = vor.u32 %v2002_v1, %v1717_v0  ;;  %v1693_v7 = vld [vmem:[#allocation2 + $0x20] sm:$0xf]  ;;  %v1997_v8 = vld [vmem:[#allocation2 + $0x2c] sm:$0xf0] }
  0x1d   :  { %352 = vmatpush.bf16.msra.mxu2 %v1750_v46  ;;  %381 = vmatpush.bf16.msra.mxu3 %v1754_v50  ;;  %v1995_v9 = vld [vmem:[#allocation2 + $0x24] sm:$0xf]  ;;  %v1722_v10 = vor.u32 %v2000_v2, %v1719_v3  ;;  %v1695_v11 = vld [vmem:[#allocation2 + $0x30] sm:$0xf0]  ;;  %v1701_v12 = vld [vmem:[#allocation2 + $0x28] sm:$0xf]  ;;  %v1694_v16 = vor.u32 %v1997_v8, %v1693_v7 }
  0x1e   :  { %v1998_v13 = vld [vmem:[#allocation2 + $0x34] sm:$0xf0]  ;;  %v1996_v14 = vld [vmem:[#allocation2 + $0x2c] sm:$0xf]  ;;  %v1703_v15 = vld [vmem:[#allocation2 + $0x38] sm:$0xf0]  ;;  %v1698_v18 = vor.u32 %v1995_v9, %v1695_v11 }
  0x1f   :  { %295 = vmatpush.bf16.msra.mxu0 %v1726_v56  ;;  %v1677_v17 = vld [vmem:[#allocation2] sm:$0xf]  ;;  %v1702_v19 = vor.u32 %v1998_v13, %v1701_v12  ;;  %v1993_v20 = vld [vmem:[#allocation2 + $0xc] sm:$0xf0]  ;;  %v1991_v21 = vld [vmem:[#allocation2 + $0x4] sm:$0xf]  ;;  %v1706_v23 = vor.u32 %v1996_v14, %v1703_v15 }
  0x20   :  { %324 = vmatpush.bf16.msra.mxu1 %v1730_v57  ;;  %v1679_v22 = vld [vmem:[#allocation2 + $0x10] sm:$0xf0]  ;;  %v1685_v24 = vld [vmem:[#allocation2 + $0x8] sm:$0xf]  ;;  %v1994_v25 = vld [vmem:[#allocation2 + $0x14] sm:$0xf0]  ;;  %v1678_v30 = vor.u32 %v1993_v20, %v1677_v17 }
  0x21   :  { %353 = vmatpush.bf16.msra.mxu2 %v1734_v58  ;;  %382 = vmatpush.bf16.msra.mxu3 %v1738_v62  ;;  %v1992_v26 = vld [vmem:[#allocation2 + $0xc] sm:$0xf]  ;;  %v1687_v27 = vld [vmem:[#allocation2 + $0x18] sm:$0xf0]  ;;  %v1917_v28 = vld [vmem:[#allocation5 + $0xe0] sm:$0xf]  ;;  %v1682_v33 = vor.u32 %v1991_v21, %v1679_v22  ;;  %v1686_v34 = vor.u32 %v1994_v25, %v1685_v24 }
  0x22   :  { %v2053_v29 = vld [vmem:[#allocation5 + $0xec] sm:$0xf0]  ;;  %v2051_v31 = vld [vmem:[#allocation5 + $0xe4] sm:$0xf]  ;;  %v1919_v32 = vld [vmem:[#allocation5 + $0xf0] sm:$0xf0]  ;;  %v1690_v36 = vor.u32 %v1992_v26, %v1687_v27 }
  0x23   :  { %296 = vmatpush.bf16.msra.mxu0 %v1710_v4  ;;  %v1987_v35 = vld [vmem:[%s2836_s0] sm:$0xff]  ;;  %v2326_v37 = vor.u32 %v2053_v29, %v1917_v28  ;;  %v1925_v38 = vld [vmem:[#allocation5 + $0xe8] sm:$0xf]  ;;  %v2054_v39 = vld [vmem:[#allocation5 + $0xf4] sm:$0xf0]  ;;  %v2328_v41 = vor.u32 %v2051_v31, %v1919_v32  ;;  %s2281_s8 = smov [#allocation7]  }
  0x24   :  { %325 = vmatpush.bf16.msra.mxu1 %v1714_v5  ;;  %v1901_v40 = vld [vmem:[#allocation5 + $0xc0] sm:$0xf]  ;;  %v2049_v42 = vld [vmem:[#allocation5 + $0xcc] sm:$0xf0]  ;;  %v2052_v43 = vld [vmem:[#allocation5 + $0xec] sm:$0xf]  ;;  %v2330_v47 = vor.u32 %v2054_v39, %v1925_v38 }
  0x25   :  { %354 = vmatpush.bf16.msra.mxu2 %v1718_v6  ;;  %383 = vmatpush.bf16.msra.mxu3 %v1722_v10  ;;  %v1927_v44 = vld [vmem:[#allocation5 + $0xf8] sm:$0xf0]  ;;  %v2047_v45 = vld [vmem:[#allocation5 + $0xc4] sm:$0xf]  ;;  %v1903_v46 = vld [vmem:[#allocation5 + $0xd0] sm:$0xf0]  ;;  %v2333_v48 = vor.u32 %v2049_v42, %v1901_v40 }
  0x26   :  { %v1909_v49 = vld [vmem:[#allocation5 + $0xc8] sm:$0xf]  ;;  %v2050_v50 = vld [vmem:[#allocation5 + $0xd4] sm:$0xf0]  ;;  %v2335_v51 = vor.u32 %v2052_v43, %v1927_v44  ;;  %v1885_v52 = vld [vmem:[#allocation5 + $0xa0] sm:$0xf]  ;;  %v2338_v53 = vor.u32 %v2047_v45, %v1903_v46 }
  0x27   :  { %297 = vmatpush.bf16.msra.mxu0 %v1694_v16  ;;  %v2045_v54 = vld [vmem:[#allocation5 + $0xac] sm:$0xf0]  ;;  %v2048_v55 = vld [vmem:[#allocation5 + $0xcc] sm:$0xf]  ;;  %v1911_v56 = vld [vmem:[#allocation5 + $0xd8] sm:$0xf0]  ;;  %v2341_v59 = vor.u32 %v2050_v50, %v1909_v49 }
  0x28   :  { %326 = vmatpush.bf16.msra.mxu1 %v1698_v18  ;;  %v2043_v57 = vld [vmem:[#allocation5 + $0xa4] sm:$0xf]  ;;  %v1887_v58 = vld [vmem:[#allocation5 + $0xb0] sm:$0xf0]  ;;  %v2345_v60 = vor.u32 %v2045_v54, %v1885_v52  ;;  %v1893_v61 = vld [vmem:[#allocation5 + $0xa8] sm:$0xf]  ;;  %v2347_v63 = vor.u32 %v2048_v55, %v1911_v56 }
  0x29   :  { %355 = vmatpush.bf16.msra.mxu2 %v1702_v19  ;;  %384 = vmatpush.bf16.msra.mxu3 %v1706_v23  ;;  %v2046_v62 = vld [vmem:[#allocation5 + $0xb4] sm:$0xf0]  ;;  %v1869_v0 = vld [vmem:[#allocation5 + $0x80] sm:$0xf]  ;;  %v2350_v1 = vor.u32 %v2043_v57, %v1887_v58  ;;  %v2041_v2 = vld [vmem:[#allocation5 + $0x8c] sm:$0xf0] }
  0x2a   :  { %v2044_v3 = vld [vmem:[#allocation5 + $0xac] sm:$0xf]  ;;  %v1895_v4 = vld [vmem:[#allocation5 + $0xb8] sm:$0xf0]  ;;  %v2039_v5 = vld [vmem:[#allocation5 + $0x84] sm:$0xf]  ;;  %v2353_v7 = vor.u32 %v2046_v62, %v1893_v61  ;;  %v2357_v8 = vor.u32 %v2041_v2, %v1869_v0 }
  0x2b   :  { %298 = vmatpush.bf16.msra.mxu0 %v1678_v30  ;;  %v1871_v6 = vld [vmem:[#allocation5 + $0x90] sm:$0xf0]  ;;  %v1877_v9 = vld [vmem:[#allocation5 + $0x88] sm:$0xf]  ;;  %v2042_v10 = vld [vmem:[#allocation5 + $0x94] sm:$0xf0]  ;;  %v2359_v11 = vor.u32 %v2044_v3, %v1895_v4 }
  0x2c   :  { %327 = vmatpush.bf16.msra.mxu1 %v1682_v33  ;;  %v1853_v12 = vld [vmem:[#allocation5 + $0x60] sm:$0xf]  ;;  %v2362_v13 = vor.u32 %v2039_v5, %v1871_v6  ;;  %v2037_v14 = vld [vmem:[#allocation5 + $0x6c] sm:$0xf0]  ;;  %v2040_v15 = vld [vmem:[#allocation5 + $0x8c] sm:$0xf]  ;;  %v2368_v20 = vor.u32 %v2042_v10, %v1877_v9 }
  0x2d   :  { %356 = vmatpush.bf16.msra.mxu2 %v1686_v34  ;;  %385 = vmatpush.bf16.msra.mxu3 %v1690_v36  ;;  %v1879_v16 = vld [vmem:[#allocation5 + $0x98] sm:$0xf0]  ;;  %v2035_v17 = vld [vmem:[#allocation5 + $0x64] sm:$0xf]  ;;  %v1855_v18 = vld [vmem:[#allocation5 + $0x70] sm:$0xf0]  ;;  %v2372_v21 = vor.u32 %v2037_v14, %v1853_v12 }
  0x2e   :  { %299 = vmatmul.bf16.vlgmr.msra.gmra.mxu0 %v1987_v35  ;;  %v1988_v19 = vld [vmem:[%s2836_s0 + $0x8] sm:$0xff]  ;;  %v2038_v23 = vld [vmem:[#allocation5 + $0x74] sm:$0xf0]  ;;  %v2374_v24 = vor.u32 %v2040_v15, %v1879_v16  ;;  %v1837_v25 = vld [vmem:[#allocation5 + $0x40] sm:$0xf]  ;;  %v2377_v26 = vor.u32 %v2035_v17, %v1855_v18  ;;  %v2280_v18 = vmov 0  }
  0x2f   :  { %599 = vmatpush.bf16.msrb.mxu0 %v2326_v37  ;;  %328 = vmatmul.bf16.vlgmr.msra.gmra.mxu1 %v1987_v35  ;;  %v1861_v22 = vld [vmem:[#allocation5 + $0x68] sm:$0xf]  ;;  %v2033_v27 = vld [vmem:[#allocation5 + $0x4c] sm:$0xf0]  ;;  %v2036_v28 = vld [vmem:[#allocation5 + $0x6c] sm:$0xf] }
  0x30   :  { %612 = vmatpush.bf16.msrb.mxu1 %v2328_v41  ;;  %357 = vmatmul.bf16.vlgmr.msra.gmra.mxu2 %v1987_v35  ;;  %v1863_v29 = vld [vmem:[#allocation5 + $0x78] sm:$0xf0]  ;;  %v2031_v30 = vld [vmem:[#allocation5 + $0x44] sm:$0xf]  ;;  %v1839_v31 = vld [vmem:[#allocation5 + $0x50] sm:$0xf0]  ;;  %v2380_v32 = vor.u32 %v2038_v23, %v1861_v22  ;;  %v2384_v33 = vor.u32 %v2033_v27, %v1837_v25 }
  0x31   :  { %386 = vmatmul.bf16.vlgmr.msra.gmra.mxu3 %v1987_v35  ;;  %625 = vmatpush.bf16.msrb.mxu2 %v2330_v47  ;;  %v1845_v34 = vld [vmem:[#allocation5 + $0x48] sm:$0xf]  ;;  %v2034_v35 = vld [vmem:[#allocation5 + $0x54] sm:$0xf0]  ;;  %v2386_v36 = vor.u32 %v2036_v28, %v1863_v29  ;;  %v2389_v38 = vor.u32 %v2031_v30, %v1839_v31  ;;  %v1821_v40 = vld [vmem:[#allocation5 + $0x20] sm:$0xf] }
  0x32   :  { %638 = vmatpush.bf16.msrb.mxu3 %v2335_v51  ;;  %v2392_v39 = vor.u32 %v2034_v35, %v1845_v34  ;;  %v2029_v42 = vld [vmem:[#allocation5 + $0x2c] sm:$0xf0]  ;;  %v2027_v43 = vld [vmem:[#allocation5 + $0x24] sm:$0xf]  ;;  %v1823_v45 = vld [vmem:[#allocation5 + $0x30] sm:$0xf0] }
  0x33   :  { %600 = vmatpush.bf16.msrb.mxu0 %v2333_v48  ;;  %v2396_v44 = vor.u32 %v2029_v42, %v1821_v40  ;;  %v1829_v46 = vld [vmem:[#allocation5 + $0x28] sm:$0xf]  ;;  %v2030_v49 = vld [vmem:[#allocation5 + $0x34] sm:$0xf0]  ;;  %v2399_v50 = vor.u32 %v2027_v43, %v1823_v45  ;;  %v2032_v52 = vld [vmem:[#allocation5 + $0x4c] sm:$0xf] }
  0x34   :  { %613 = vmatpush.bf16.msrb.mxu1 %v2338_v53  ;;  %v1847_v54 = vld [vmem:[#allocation5 + $0x58] sm:$0xf0]  ;;  %v1805_v55 = vld [vmem:[#allocation5] sm:$0xf]  ;;  %v2025_v57 = vld [vmem:[#allocation5 + $0xc] sm:$0xf0]  ;;  %v2404_v62 = vor.u32 %v2030_v49, %v1829_v46 }
  0x35   :  { %626 = vmatpush.bf16.msrb.mxu2 %v2341_v59  ;;  %v2401_v56 = vor.u32 %v2032_v52, %v1847_v54  ;;  %v2023_v58 = vld [vmem:[#allocation5 + $0x4] sm:$0xf]  ;;  %v1807_v61 = vld [vmem:[#allocation5 + $0x10] sm:$0xf0]  ;;  %v2028_v0 = vld [vmem:[#allocation5 + $0x2c] sm:$0xf]  ;;  %v2408_v3 = vor.u32 %v2025_v57, %v1805_v55 }
  0x36   :  { %639 = vmatpush.bf16.msrb.mxu3 %v2347_v63  ;;  %v1831_v2 = vld [vmem:[#allocation5 + $0x38] sm:$0xf0]  ;;  %v1813_v5 = vld [vmem:[#allocation5 + $0x8] sm:$0xf]  ;;  %v2026_v6 = vld [vmem:[#allocation5 + $0x14] sm:$0xf0]  ;;  %v2413_v9 = vor.u32 %v2023_v58, %v1807_v61 }
  0x37   :  { %601 = vmatpush.bf16.msrb.mxu0 %v2345_v60  ;;  %v2410_v4 = vor.u32 %v2028_v0, %v1831_v2  ;;  %v2024_v10 = vld [vmem:[#allocation5 + $0xc] sm:$0xf]  ;;  %v1815_v12 = vld [vmem:[#allocation5 + $0x18] sm:$0xf0]  ;;  %v2416_v14 = vor.u32 %v2026_v6, %v1813_v5  ;;  %v1989_v16 = vld [vmem:[%s2836_s0 + $0x10] sm:$0xff]  ;;  %s1646_s1 = sshll.u32 %s2281_s8, 4  ;;  %s1647_s1 = int_to_ptr.vmem [resolvable:$true] %s1646_s1 }
  0x38   :  { %614 = vmatpush.bf16.msrb.mxu1 %v2350_v1  ;;  %v2420_v15 = vor.u32 %v2024_v10, %v1815_v12  ;;  %v1990_v17 = vld [vmem:[%s2836_s0 + $0x18] sm:$0xff]  ;;  %v97_v23 = vld [vmem:[%s2839_s3] sm:$0xf]  ;;  %s1648_s10 = sshll.u32 %s2842_s6, 4  ;;  %s1649_s10 = int_to_ptr.hbm [resolvable:$true] %s1648_s10 }
  0x39   :  { %627 = vmatpush.bf16.msrb.mxu2 %v2353_v7  ;;  %v100_v27 = vperm.slane %v97_v23, 1  ;;  %v2506_v34 = vperm.slane %v97_v23, 3  ;;  %v2508_v35 = vperm.slane %v97_v23, 2  ;;  %v2510_v40 = vperm.slane %v97_v23, 0 }
  0x3a   :  { %640 = vmatpush.bf16.msrb.mxu3 %v2359_v11 }
  0x3b   :  { %602 = vmatpush.bf16.msrb.mxu0 %v2357_v8 }
  0x3c   :  { %615 = vmatpush.bf16.msrb.mxu1 %v2362_v13 }
  0x3d   :  { %628 = vmatpush.bf16.msrb.mxu2 %v2368_v20 }
  0x3e   :  { %641 = vmatpush.bf16.msrb.mxu3 %v2374_v24  ;;  %304 = vmatmul.bf16.gmra.mxu0 %v1988_v19 }
  0x3f   :  { %603 = vmatpush.bf16.msrb.mxu0 %v2372_v21  ;;  %333 = vmatmul.bf16.gmra.mxu1 %v1988_v19 }
  0x40   :  { %616 = vmatpush.bf16.msrb.mxu1 %v2377_v26  ;;  %362 = vmatmul.bf16.gmra.mxu2 %v1988_v19 }
  0x41   :  { %391 = vmatmul.bf16.gmra.mxu3 %v1988_v19  ;;  %629 = vmatpush.bf16.msrb.mxu2 %v2380_v32 }
  0x42   :  { %642 = vmatpush.bf16.msrb.mxu3 %v2386_v36 }
  0x43   :  { %604 = vmatpush.bf16.msrb.mxu0 %v2384_v33 }
  0x44   :  { %617 = vmatpush.bf16.msrb.mxu1 %v2389_v38 }
  0x45   :  { %630 = vmatpush.bf16.msrb.mxu2 %v2392_v39 }
  0x46   :  { %643 = vmatpush.bf16.msrb.mxu3 %v2401_v56 }
  0x47   :  { %605 = vmatpush.bf16.msrb.mxu0 %v2396_v44 }
  0x48   :  { %618 = vmatpush.bf16.msrb.mxu1 %v2399_v50 }
  0x49   :  { %631 = vmatpush.bf16.msrb.mxu2 %v2404_v62 }
  0x4a   :  { %644 = vmatpush.bf16.msrb.mxu3 %v2410_v4 }
  0x4b   :  { %606 = vmatpush.bf16.msrb.mxu0 %v2408_v3 }
  0x4c   :  { %619 = vmatpush.bf16.msrb.mxu1 %v2413_v9 }
  0x4d   :  { %632 = vmatpush.bf16.msrb.mxu2 %v2416_v14 }
  0x4e   :  { %645 = vmatpush.bf16.msrb.mxu3 %v2420_v15  ;;  %309 = vmatmul.bf16.gmra.mxu0 %v1989_v16 }
  0x4f   :  { %719 = vmatpush.bf16.msra.mxu0 %v2326_v37  ;;  %338 = vmatmul.bf16.gmra.mxu1 %v1989_v16 }
  0x50   :  { %732 = vmatpush.bf16.msra.mxu1 %v2328_v41  ;;  %367 = vmatmul.bf16.gmra.mxu2 %v1989_v16 }
  0x51   :  { %745 = vmatpush.bf16.msra.mxu2 %v2330_v47  ;;  %396 = vmatmul.bf16.gmra.mxu3 %v1989_v16 }
  0x52   :  { %758 = vmatpush.bf16.msra.mxu3 %v2335_v51 }
  0x53   :  { %720 = vmatpush.bf16.msra.mxu0 %v2333_v48 }
  0x54   :  { %733 = vmatpush.bf16.msra.mxu1 %v2338_v53 }
  0x55   :  { %746 = vmatpush.bf16.msra.mxu2 %v2341_v59 }
  0x56   :  { %759 = vmatpush.bf16.msra.mxu3 %v2347_v63 }
  0x57   :  { %721 = vmatpush.bf16.msra.mxu0 %v2345_v60 }
  0x58   :  { %734 = vmatpush.bf16.msra.mxu1 %v2350_v1 }
  0x59   :  { %747 = vmatpush.bf16.msra.mxu2 %v2353_v7 }
  0x5a   :  { %760 = vmatpush.bf16.msra.mxu3 %v2359_v11 }
  0x5b   :  { %722 = vmatpush.bf16.msra.mxu0 %v2357_v8 }
  0x5c   :  { %735 = vmatpush.bf16.msra.mxu1 %v2362_v13 }
  0x5d   :  { %748 = vmatpush.bf16.msra.mxu2 %v2368_v20 }
  0x5e   :  { %761 = vmatpush.bf16.msra.mxu3 %v2374_v24  ;;  %314 = vmatmul.bf16.gmra.mxu0 %v1990_v17 }
  0x5f   :  { %723 = vmatpush.bf16.msra.mxu0 %v2372_v21  ;;  %343 = vmatmul.bf16.gmra.mxu1 %v1990_v17 }
  0x60   :  { %736 = vmatpush.bf16.msra.mxu1 %v2377_v26  ;;  %372 = vmatmul.bf16.gmra.mxu2 %v1990_v17 }
  0x61   :  { %749 = vmatpush.bf16.msra.mxu2 %v2380_v32  ;;  %401 = vmatmul.bf16.gmra.mxu3 %v1990_v17 }
  0x62   :  { %762 = vmatpush.bf16.msra.mxu3 %v2386_v36 }
  0x63   :  { %724 = vmatpush.bf16.msra.mxu0 %v2384_v33 }
  0x64   :  { %737 = vmatpush.bf16.msra.mxu1 %v2389_v38 }
  0x65   :  { %750 = vmatpush.bf16.msra.mxu2 %v2392_v39 }
  0x66   :  { %763 = vmatpush.bf16.msra.mxu3 %v2401_v56 }
  0x67   :  { %725 = vmatpush.bf16.msra.mxu0 %v2396_v44 }
  0x68   :  { %738 = vmatpush.bf16.msra.mxu1 %v2399_v50 }
  0x69   :  { %751 = vmatpush.bf16.msra.mxu2 %v2404_v62 }
  0x6a   :  { %764 = vmatpush.bf16.msra.mxu3 %v2410_v4 }
  0x6b   :  { %726 = vmatpush.bf16.msra.mxu0 %v2408_v3 }
  0x6c   :  { %739 = vmatpush.bf16.msra.mxu1 %v2413_v9 }
  0x6d   :  { %752 = vmatpush.bf16.msra.mxu2 %v2416_v14 }
  0x6e   :  { %765 = vmatpush.bf16.msra.mxu3 %v2420_v15  ;;  %607 = vmatmul.bf16.vlgmr.msrb.gmra.mxu0 %v2280_v18 }
  0x6f   :  { %620 = vmatmul.bf16.vlgmr.msrb.gmra.mxu1 %v2280_v18  ;;  %839 = vmatpush.bf16.msrb.mxu0 %v2326_v37 }
  0x70   :  { %633 = vmatmul.bf16.vlgmr.msrb.gmra.mxu2 %v2280_v18  ;;  %852 = vmatpush.bf16.msrb.mxu1 %v2328_v41 }
  0x71   :  { %646 = vmatmul.bf16.vlgmr.msrb.gmra.mxu3 %v2280_v18  ;;  %865 = vmatpush.bf16.msrb.mxu2 %v2330_v47 }
  0x72   :  { %878 = vmatpush.bf16.msrb.mxu3 %v2335_v51 }
  0x73   :  { %840 = vmatpush.bf16.msrb.mxu0 %v2333_v48 }
  0x74   :  { %853 = vmatpush.bf16.msrb.mxu1 %v2338_v53 }
  0x75   :  { %866 = vmatpush.bf16.msrb.mxu2 %v2341_v59 }
  0x76   :  { %879 = vmatpush.bf16.msrb.mxu3 %v2347_v63 }
  0x77   :  { %841 = vmatpush.bf16.msrb.mxu0 %v2345_v60 }
  0x78   :  { %854 = vmatpush.bf16.msrb.mxu1 %v2350_v1 }
  0x79   :  { %867 = vmatpush.bf16.msrb.mxu2 %v2353_v7 }
  0x7a   :  { %880 = vmatpush.bf16.msrb.mxu3 %v2359_v11 }
  0x7b   :  { %842 = vmatpush.bf16.msrb.mxu0 %v2357_v8 }
  0x7c   :  { %855 = vmatpush.bf16.msrb.mxu1 %v2362_v13 }
  0x7d   :  { %868 = vmatpush.bf16.msrb.mxu2 %v2368_v20 }
  0x7e   :  { %881 = vmatpush.bf16.msrb.mxu3 %v2374_v24 }
  0x7f   :  { %843 = vmatpush.bf16.msrb.mxu0 %v2372_v21 }
  0x80   :  { %856 = vmatpush.bf16.msrb.mxu1 %v2377_v26 }
  0x81   :  { %869 = vmatpush.bf16.msrb.mxu2 %v2380_v32 }
  0x82   :  { %882 = vmatpush.bf16.msrb.mxu3 %v2386_v36 }
  0x83   :  { %844 = vmatpush.bf16.msrb.mxu0 %v2384_v33 }
  0x84   :  { %857 = vmatpush.bf16.msrb.mxu1 %v2389_v38 }
  0x85   :  { %870 = vmatpush.bf16.msrb.mxu2 %v2392_v39 }
  0x86   :  { %883 = vmatpush.bf16.msrb.mxu3 %v2401_v56 }
  0x87   :  { %845 = vmatpush.bf16.msrb.mxu0 %v2396_v44 }
  0x88   :  { %858 = vmatpush.bf16.msrb.mxu1 %v2399_v50 }
  0x89   :  { %871 = vmatpush.bf16.msrb.mxu2 %v2404_v62 }
  0x8a   :  { %884 = vmatpush.bf16.msrb.mxu3 %v2410_v4 }
  0x8b   :  { %846 = vmatpush.bf16.msrb.mxu0 %v2408_v3 }
  0x8c   :  { %859 = vmatpush.bf16.msrb.mxu1 %v2413_v9 }
  0x8d   :  { %872 = vmatpush.bf16.msrb.mxu2 %v2416_v14 }
  0x8e   :  { %885 = vmatpush.bf16.msrb.mxu3 %v2420_v15 }
  0xab   :  { %v300_v19 = vpop.f32.mrf.mxu0 }
  0xac   :  { %v329_v22 = vpop.f32.mrf.mxu1 }
  0xb3   :  { %v2498_v25 = vpop.f32.mrf.mxu2  ;;  %v2502_v29 = vpop.f32.mrf.mxu0 }
  0xb4   :  { %v2500_v28 = vpop.f32.mrf.mxu3  ;;  %v331_v30 = vpop.f32.mrf.mxu1 }
  0xb5   :  { %v2504_v31 = vadd.f32 %v331_v30, %v100_v27 }
  0xbb   :  { %v360_v42 = vpop.f32.mrf.mxu2  ;;  %v305_v46 = vpop.f32.mrf.mxu0 }
  0xbc   :  { %v2513_v43 = vadd.f32 %v360_v42, %v2508_v35  ;;  %v389_v45 = vpop.f32.mrf.mxu3  ;;  %v2519_v52 = vadd.f32 %v305_v46, %v2510_v40  ;;  %v334_v54 = vpop.f32.mrf.mxu1 }
  0xbd   :  { %v2516_v49 = vadd.f32 %v389_v45, %v2506_v34  ;;  %v2521_v55 = vadd.f32 %v334_v54, %v100_v27 }
  0xbf   :  { %2843 = vst [vmem:[#allocation11_spill] sm:$0xff] %v2521_v55 }
  0xc3   :  { %v363_v57 = vpop.f32.mrf.mxu2  ;;  %v307_v0 = vpop.f32.mrf.mxu0 }
  0xc4   :  { %v2524_v58 = vadd.f32 %v363_v57, %v2508_v35  ;;  %v392_v61 = vpop.f32.mrf.mxu3  ;;  %v2530_v5 = vadd.f32 %v307_v0, %v2510_v40  ;;  %v336_v6 = vpop.f32.mrf.mxu1 }
  0xc5   :  { %v2527_v2 = vadd.f32 %v392_v61, %v2506_v34  ;;  %v2532_v10 = vadd.f32 %v336_v6, %v100_v27 }
  0xc6   :  { %2844 = vst [vmem:[#allocation12_spill] sm:$0xff] %v2524_v58 }
  0xc7   :  { %2845 = vst [vmem:[#allocation13_spill] sm:$0xff] %v2527_v2 }
  0xc8   :  { %2846 = vst [vmem:[#allocation14_spill] sm:$0xff] %v2530_v5 }
  0xc9   :  { %2847 = vst [vmem:[#allocation15_spill] sm:$0xff] %v2532_v10 }
  0xcb   :  { %v365_v12 = vpop.f32.mrf.mxu2  ;;  %v310_v18 = vpop.f32.mrf.mxu0 }
  0xcc   :  { %v2535_v16 = vadd.f32 %v365_v12, %v2508_v35  ;;  %v394_v17 = vpop.f32.mrf.mxu3  ;;  %v2541_v30 = vadd.f32 %v310_v18, %v2510_v40  ;;  %v339_v42 = vpop.f32.mrf.mxu1 }
  0xcd   :  { %v2538_v23 = vadd.f32 %v394_v17, %v2506_v34  ;;  %v2543_v45 = vadd.f32 %v339_v42, %v100_v27 }
  0xce   :  { %2848 = vst [vmem:[#allocation16_spill] sm:$0xff] %v2535_v16 }
  0xcf   :  { %2849 = vst [vmem:[#allocation17_spill] sm:$0xff] %v2538_v23 }
  0xd0   :  { %2850 = vst [vmem:[#allocation18_spill] sm:$0xff] %v2541_v30 }
  0xd1   :  { %2851 = vst [vmem:[#allocation19_spill] sm:$0xff] %v2543_v45 }
  0xd3   :  { %v368_v46 = vpop.f32.mrf.mxu2  ;;  %v312_v61 = vpop.f32.mrf.mxu0 }
  0xd4   :  { %v2546_v54 = vadd.f32 %v368_v46, %v2508_v35  ;;  %v397_v57 = vpop.f32.mrf.mxu3  ;;  %v2552_v6 = vadd.f32 %v312_v61, %v2510_v40  ;;  %v341_v12 = vpop.f32.mrf.mxu1 }
  0xd5   :  { %v2549_v0 = vadd.f32 %v397_v57, %v2506_v34  ;;  %v2554_v17 = vadd.f32 %v341_v12, %v100_v27 }
  0xd6   :  { %2852 = vst [vmem:[#allocation20_spill] sm:$0xff] %v2546_v54 }
  0xd7   :  { %2853 = vst [vmem:[#allocation21_spill] sm:$0xff] %v2549_v0 }
  0xd8   :  { %2854 = vst [vmem:[#allocation22_spill] sm:$0xff] %v2552_v6 }
  0xd9   :  { %2855 = vst [vmem:[#allocation23_spill] sm:$0xff] %v2554_v17 }
  0xdb   :  { %v370_v18 = vpop.f32.mrf.mxu2  ;;  %v315_v45 = vpop.f32.mrf.mxu0 }
  0xdc   :  { %v2557_v30 = vadd.f32 %v370_v18, %v2508_v35  ;;  %v399_v42 = vpop.f32.mrf.mxu3  ;;  %v2563_v54 = vadd.f32 %v315_v45, %v2510_v40  ;;  %v344_v57 = vpop.f32.mrf.mxu1  ;;  %v301_v45 = vadd.f32 %v300_v19, %v2510_v40 }
  0xdd   :  { %v2560_v46 = vadd.f32 %v399_v42, %v2506_v34  ;;  %v2565_v0 = vadd.f32 %v344_v57, %v100_v27  ;;  %v330_v57 = vadd.f32 %v329_v22, %v100_v27 }
  0xde   :  { %2856 = vst [vmem:[#allocation24_spill] sm:$0xff] %v2557_v30 }
  0xdf   :  { %2857 = vst [vmem:[#allocation25_spill] sm:$0xff] %v2560_v46 }
  0xe0   :  { %2858 = vst [vmem:[#allocation26_spill] sm:$0xff] %v2563_v54 }
  0xe1   :  { %2859 = vst [vmem:[#allocation27_spill] sm:$0xff] %v2565_v0 }
  0xe3   :  { %v373_v61 = vpop.f32.mrf.mxu2  ;;  %v317_v17 = vpop.f32.mrf.mxu0 }
  0xe4   :  { %v2568_v6 = vadd.f32 %v373_v61, %v2508_v35  ;;  %v402_v12 = vpop.f32.mrf.mxu3  ;;  %v2574_v30 = vadd.f32 %v317_v17, %v2510_v40  ;;  %v346_v42 = vpop.f32.mrf.mxu1 }
  0xe5   :  { %v2571_v18 = vadd.f32 %v402_v12, %v2506_v34  ;;  %v2576_v46 = vadd.f32 %v346_v42, %v100_v27  ;;  %v359_v42 = vadd.f32 %v2498_v25, %v2508_v35  ;;  %v388_v25 = vadd.f32 %v2500_v28, %v2506_v34 }
  0xe6   :  { %2860 = vst [vmem:[#allocation28_spill] sm:$0xff] %v2568_v6 }
  0xe7   :  { %2861 = vst [vmem:[#allocation29_spill] sm:$0xff] %v2571_v18 }
  0xe8   :  { %2862 = vst [vmem:[#allocation30_spill] sm:$0xff] %v2574_v30 }
  0xe9   :  { %2863 = vst [vmem:[#allocation31_spill] sm:$0xff] %v2576_v46 }
  0xeb   :  { %v375_v54 = vpop.f32.mrf.mxu2  ;;  %v608_v6 = vpop.f32.mrf.mxu0 }
  0xec   :  { %v2580_v0 = vadd.f32 %v375_v54, %v2508_v35  ;;  %v404_v61 = vpop.f32.mrf.mxu3  ;;  %v651_v12 = vadd.f32 %v608_v6, %v301_v45  ;;  %v621_v18 = vpop.f32.mrf.mxu1 }
  0xed   :  { %v2583_v23 = vadd.f32 %v404_v61, %v2506_v34  ;;  %v652_v16 = vadd.f32 %v621_v18, %v330_v57 }
  0xee   :  { %2864 = vst [vmem:[#allocation32_spill] sm:$0xff] %v2580_v0  ;;  %v1931_v17 = vmul.f32 -1.442695, %v651_v12 }
  0xef   :  { %2865 = vst [vmem:[#allocation33_spill] sm:$0xff] %v2583_v23  ;;  %v1932_v30 = vmul.f32 -1.442695, %v652_v16 }
  0xf0   :  { %2070 = vpow2.f32 %v1931_v17 }
  0xf1   :  { %2072 = vpow2.f32 %v1932_v30 }
  0xf3   :  { %v634_v19 = vpop.f32.mrf.mxu2  ;;  %v610_v54 = vpop.f32.mrf.mxu0 }
  0xf4   :  { %v653_v22 = vadd.f32 %v634_v19, %v359_v42  ;;  %v647_v27 = vpop.f32.mrf.mxu3  ;;  %v623_v0 = vpop.f32.mrf.mxu1 }
  0xf5   :  { %v654_v57 = vadd.f32 %v647_v27, %v388_v25 }
  0xf6   :  { %v1933_v46 = vmul.f32 -1.442695, %v653_v22  ;;  %v2071_v10 = vpop.eup %2070 }
  0xf7   :  { %v2073_v5 = vpop.eup %2072  ;;  %v664_v61 = vadd.f32 1.0, %v2071_v10 }
  0xf8   :  { %2074 = vpow2.f32 %v1933_v46  ;;  %v665_v6 = vadd.f32 1.0, %v2073_v5 }
  0xf9   :  { %2076 = vrcp.f32 %v664_v61  ;;  %v678_v10 = vand.u32 2147483648, %v664_v61  ;;  %v676_v22 = vand.u32 2147483647, %v664_v61  ;;  %vm672_vm2 = vweird.f32 %v664_v61 }
  0xfa   :  { %2078 = vrcp.f32 %v665_v6  ;;  %v693_v5 = vand.u32 2147483648, %v665_v6  ;;  %vm687_vm3 = vweird.f32 %v665_v6 }
  0xfb   :  { %v636_v18 = vpop.f32.mrf.mxu2  ;;  %v679_v27 = vor.u32 1.1754944e-38, %v678_v10  ;;  %vm677_vm5 = vcmp.eq.f32.partialorder %v676_v22, 8.507059e+37 }
  0xfc   :  { %v649_v16 = vpop.f32.mrf.mxu3  ;;  %v691_v18 = vand.u32 2147483647, %v665_v6  ;;  %v694_v25 = vor.u32 1.1754944e-38, %v693_v5 }
  0xfe   :  { %v2075_v45 = vpop.eup %2074  ;;  %vm692_vm7 = vcmp.eq.f32.partialorder %v691_v18, 8.507059e+37 }
  0xff   :  { %v666_v35 = vadd.f32 1.0, %v2075_v45  ;;  %v2077_v30 = vpop.eup %2076 }
 0x100   :  { %v2079_v12 = vpop.eup %2078  ;;  %v668_v17 = vmul.f32 %v2077_v30, %v664_v61  ;;  %vm673_vm0 = vweird.f32 %v2077_v30 }
 0x101   :  { %2080 = vrcp.f32 %v666_v35  ;;  %v683_v0 = vmul.f32 %v2079_v12, %v665_v6  ;;  %vm688_vm1 = vweird.f32 %v2079_v12  ;;  %vm674_vm4 = vmor %vm672_vm2, %vm673_vm0  ;;  %v708_v6 = vand.u32 2147483648, %v666_v35 }
 0x102   :  { %v669_v42 = vsub.f32 1.0, %v668_v17  ;;  %2082 = vtanh.f32 %v654_v57  ;;  %vm689_vm6 = vmor %vm687_vm3, %vm688_vm1  ;;  %vm702_vm9 = vweird.f32 %v666_v35 }
 0x103   :  { %v684_v19 = vsub.f32 1.0, %v683_v0  ;;  %v709_v5 = vor.u32 1.1754944e-38, %v708_v6 }
 0x104   :  { %v670_v46 = vmul.f32 %v2077_v30, %v669_v42 }
 0x105   :  { %v685_v54 = vmul.f32 %v2079_v12, %v684_v19 }
 0x106   :  { %v671_v28 = vadd.f32 %v2077_v30, %v670_v46 }
 0x107   :  { %v2081_v16 = vpop.eup %2080  ;;  %v686_v45 = vadd.f32 %v2079_v12, %v685_v54 }
 0x108   :  { %v698_v34 = vmul.f32 %v2081_v16, %v666_v35  ;;  %v675_v17 = vsel %vm674_vm4, %v2077_v30, %v671_v28  ;;  %v2083_v57 = vpop.eup %2082  ;;  %vm703_vm8 = vweird.f32 %v2081_v16  ;;  %v706_v30 = vand.u32 2147483647, %v666_v35 }
 0x109   :  { %v680_v42 = vsel %vm677_vm5, %v679_v27, %v675_v17  ;;  %v690_v23 = vsel %vm689_vm6, %v2079_v12, %v686_v45  ;;  %vm704_vm10 = vmor %vm702_vm9, %vm703_vm8 }
 0x10a   :  { %v699_v0 = vsub.f32 1.0, %v698_v34  ;;  %v695_v19 = vsel %vm692_vm7, %v694_v25, %v690_v23  ;;  %v714_v2 = vmul.f32 %v2083_v57, %v680_v42  ;;  %vm707_vm11 = vcmp.eq.f32.partialorder %v706_v30, 8.507059e+37 }
 0x10b   :  { %v713_v58 = vmul.f32 0.0, %v695_v19 }
 0x10c   :  { %v700_v55 = vmul.f32 %v2081_v16, %v699_v0 }
 0x10d   :  { %v2589_v46 = vadd.f32 %v714_v2, %v713_v58 }
 0x10e   :  { %v701_v61 = vadd.f32 %v2081_v16, %v700_v55  ;;  %v303_v55 = vadd.f32 %v2502_v29, %v2510_v40 }
 0x10f   :  { %2084 = vtanh.f32 %v2589_v46 }
 0x110   :  { %v705_v10 = vsel %vm704_vm10, %v2081_v16, %v701_v61 }
 0x111   :  { %v710_v12 = vsel %vm707_vm11, %v709_v5, %v705_v10 }
 0x115   :  { %v2085_v22 = vpop.eup %2084 }
 0x116   :  { %v717_v54 = vmul.f32 %v2085_v22, %v710_v12 }
 0x118   :  { %v718_v23 = vpack.c.bf16 %v717_v54, %v717_v54 }
 0x11a   :  { %727 = vmatmul.bf16.vlgmr.msra.gmra.mxu0 %v718_v23  ;;  %740 = vmatmul.bf16.vlgmr.msra.gmra.mxu1 %v718_v23 }
 0x11b   :  { %753 = vmatmul.bf16.vlgmr.msra.gmra.mxu2 %v718_v23  ;;  %766 = vmatmul.bf16.vlgmr.msra.gmra.mxu3 %v718_v23 }
 0x11c   :  { %959 = vmatpush.bf16.msra.mxu0 %v2326_v37  ;;  %972 = vmatpush.bf16.msra.mxu1 %v2328_v41 }
 0x11d   :  { %985 = vmatpush.bf16.msra.mxu2 %v2330_v47  ;;  %998 = vmatpush.bf16.msra.mxu3 %v2335_v51 }
 0x120   :  { %960 = vmatpush.bf16.msra.mxu0 %v2333_v48  ;;  %973 = vmatpush.bf16.msra.mxu1 %v2338_v53 }
 0x121   :  { %986 = vmatpush.bf16.msra.mxu2 %v2341_v59  ;;  %999 = vmatpush.bf16.msra.mxu3 %v2347_v63 }
 0x124   :  { %961 = vmatpush.bf16.msra.mxu0 %v2345_v60  ;;  %974 = vmatpush.bf16.msra.mxu1 %v2350_v1 }
 0x125   :  { %987 = vmatpush.bf16.msra.mxu2 %v2353_v7  ;;  %1000 = vmatpush.bf16.msra.mxu3 %v2359_v11 }
 0x128   :  { %962 = vmatpush.bf16.msra.mxu0 %v2357_v8  ;;  %975 = vmatpush.bf16.msra.mxu1 %v2362_v13 }
 0x129   :  { %988 = vmatpush.bf16.msra.mxu2 %v2368_v20  ;;  %1001 = vmatpush.bf16.msra.mxu3 %v2374_v24 }
 0x12c   :  { %963 = vmatpush.bf16.msra.mxu0 %v2372_v21  ;;  %976 = vmatpush.bf16.msra.mxu1 %v2377_v26 }
 0x12d   :  { %989 = vmatpush.bf16.msra.mxu2 %v2380_v32  ;;  %1002 = vmatpush.bf16.msra.mxu3 %v2386_v36 }
 0x130   :  { %964 = vmatpush.bf16.msra.mxu0 %v2384_v33  ;;  %977 = vmatpush.bf16.msra.mxu1 %v2389_v38 }
 0x131   :  { %990 = vmatpush.bf16.msra.mxu2 %v2392_v39  ;;  %1003 = vmatpush.bf16.msra.mxu3 %v2401_v56 }
 0x134   :  { %965 = vmatpush.bf16.msra.mxu0 %v2396_v44  ;;  %978 = vmatpush.bf16.msra.mxu1 %v2399_v50 }
 0x135   :  { %991 = vmatpush.bf16.msra.mxu2 %v2404_v62  ;;  %1004 = vmatpush.bf16.msra.mxu3 %v2410_v4 }
 0x138   :  { %966 = vmatpush.bf16.msra.mxu0 %v2408_v3  ;;  %979 = vmatpush.bf16.msra.mxu1 %v2413_v9 }
 0x139   :  { %992 = vmatpush.bf16.msra.mxu2 %v2416_v14  ;;  %1005 = vmatpush.bf16.msra.mxu3 %v2420_v15 }
 0x197   :  { %v728_v58 = vpop.f32.mrf.mxu0  ;;  %v741_v2 = vpop.f32.mrf.mxu1 }
 0x198   :  { %v771_v35 = vadd.f32 %v728_v58, %v303_v55  ;;  %v772_v18 = vadd.f32 %v741_v2, %v2504_v31 }
 0x19a   :  { %v1934_v16 = vmul.f32 -1.442695, %v771_v35  ;;  %v1935_v28 = vmul.f32 -1.442695, %v772_v18 }
 0x19c   :  { %2086 = vpow2.f32 %v1934_v16 }
 0x19d   :  { %2088 = vpow2.f32 %v1935_v28 }
 0x19e   :  { %v754_v34 = vpop.f32.mrf.mxu2  ;;  %v767_v27 = vpop.f32.mrf.mxu3 }
 0x19f   :  { %v773_v45 = vadd.f32 %v754_v34, %v2513_v43  ;;  %v730_v25 = vpop.f32.mrf.mxu0  ;;  %v743_v17 = vpop.f32.mrf.mxu1  ;;  %v774_v10 = vadd.f32 %v767_v27, %v2516_v49 }
 0x1a1   :  { %v1936_v57 = vmul.f32 -1.442695, %v773_v45 }
 0x1a2   :  { %v2087_v0 = vpop.eup %2086 }
 0x1a3   :  { %v2089_v42 = vpop.eup %2088  ;;  %v784_v19 = vadd.f32 1.0, %v2087_v0  ;;  %2090 = vpow2.f32 %v1936_v57 }
 0x1a4   :  { %v785_v29 = vadd.f32 1.0, %v2089_v42 }
 0x1a5   :  { %2092 = vrcp.f32 %v784_v19  ;;  %v798_v23 = vand.u32 2147483648, %v784_v19  ;;  %v796_v2 = vand.u32 2147483647, %v784_v19  ;;  %vm792_vm14 = vweird.f32 %v784_v19 }
 0x1a6   :  { %2094 = vrcp.f32 %v785_v29  ;;  %v756_v40 = vpop.f32.mrf.mxu2  ;;  %v769_v31 = vpop.f32.mrf.mxu3  ;;  %v813_v55 = vand.u32 2147483648, %v785_v29  ;;  %v811_v18 = vand.u32 2147483647, %v785_v29  ;;  %vm807_vm15 = vweird.f32 %v785_v29 }
 0x1a7   :  { %v799_v34 = vor.u32 1.1754944e-38, %v798_v23  ;;  %vm797_vm2 = vcmp.eq.f32.partialorder %v796_v2, 8.507059e+37  ;;  %v2866_v2 = vld [vmem:[#allocation11_spill] sm:$0xff] }
 0x1a8   :  { %v814_v45 = vor.u32 1.1754944e-38, %v813_v55  ;;  %vm812_vm3 = vcmp.eq.f32.partialorder %v811_v18, 8.507059e+37 }
 0x1a9   :  { %v2091_v61 = vpop.eup %2090 }
 0x1aa   :  { %v786_v6 = vadd.f32 1.0, %v2091_v61 }
 0x1ab   :  { %v2093_v30 = vpop.eup %2092 }
 0x1ac   :  { %v2095_v5 = vpop.eup %2094  ;;  %v788_v22 = vmul.f32 %v2093_v30, %v784_v19  ;;  %2096 = vrcp.f32 %v786_v6  ;;  %vm793_vm12 = vweird.f32 %v2093_v30  ;;  %vm822_vm5 = vweird.f32 %v786_v6 }
 0x1ad   :  { %v803_v43 = vmul.f32 %v2095_v5, %v785_v29  ;;  %2098 = vtanh.f32 %v774_v10  ;;  %vm808_vm13 = vweird.f32 %v2095_v5  ;;  %vm794_vm0 = vmor %vm792_vm14, %vm793_vm12 }
 0x1ae   :  { %v789_v12 = vsub.f32 1.0, %v788_v22  ;;  %vm809_vm1 = vmor %vm807_vm15, %vm808_vm13  ;;  %v828_v22 = vand.u32 2147483648, %v786_v6 }
 0x1af   :  { %v804_v54 = vsub.f32 1.0, %v803_v43 }
 0x1b0   :  { %v790_v58 = vmul.f32 %v2093_v30, %v789_v12  ;;  %v829_v12 = vor.u32 1.1754944e-38, %v828_v22  ;;  %v2868_v22 = vld [vmem:[#allocation13_spill] sm:$0xff] }
 0x1b1   :  { %v805_v35 = vmul.f32 %v2095_v5, %v804_v54 }
 0x1b2   :  { %v2097_v16 = vpop.eup %2096  ;;  %v791_v28 = vadd.f32 %v2093_v30, %v790_v58 }
 0x1b3   :  { %v818_v49 = vmul.f32 %v2097_v16, %v786_v6  ;;  %v806_v27 = vadd.f32 %v2095_v5, %v805_v35  ;;  %v2099_v17 = vpop.eup %2098  ;;  %vm823_vm4 = vweird.f32 %v2097_v16 }
 0x1b4   :  { %v795_v25 = vsel %vm794_vm0, %v2093_v30, %v791_v28  ;;  %v826_v30 = vand.u32 2147483647, %v786_v6  ;;  %vm824_vm6 = vmor %vm822_vm5, %vm823_vm4 }
 0x1b5   :  { %v819_v57 = vsub.f32 1.0, %v818_v49  ;;  %v800_v0 = vsel %vm797_vm2, %v799_v34, %v795_v25  ;;  %v810_v42 = vsel %vm809_vm1, %v2095_v5, %v806_v27  ;;  %v2867_v34 = vld [vmem:[#allocation12_spill] sm:$0xff] }
 0x1b6   :  { %v815_v40 = vsel %vm812_vm3, %v814_v45, %v810_v42  ;;  %v834_v31 = vmul.f32 %v2099_v17, %v800_v0  ;;  %vm827_vm7 = vcmp.eq.f32.partialorder %v826_v30, 8.507059e+37 }
 0x1b7   :  { %v833_v61 = vmul.f32 %v815_v40, %v2589_v46  ;;  %v820_v10 = vmul.f32 %v2097_v16, %v819_v57 }
 0x1b9   :  { %v2630_v19 = vadd.f32 %v834_v31, %v833_v61  ;;  %v821_v29 = vadd.f32 %v2097_v16, %v820_v10 }
 0x1bb   :  { %2100 = vtanh.f32 %v2630_v19  ;;  %v825_v43 = vsel %vm824_vm6, %v2097_v16, %v821_v29 }
 0x1bc   :  { %v830_v54 = vsel %vm827_vm7, %v829_v12, %v825_v43 }
 0x1c1   :  { %v2101_v5 = vpop.eup %2100 }
 0x1c2   :  { %v837_v23 = vmul.f32 %v2101_v5, %v830_v54 }
 0x1c4   :  { %v838_v55 = vpack.c.bf16 %v837_v23, %v837_v23 }
 0x1c6   :  { %847 = vmatmul.bf16.vlgmr.msrb.gmra.mxu0 %v838_v55  ;;  %860 = vmatmul.bf16.vlgmr.msrb.gmra.mxu1 %v838_v55 }
 0x1c7   :  { %873 = vmatmul.bf16.vlgmr.msrb.gmra.mxu2 %v838_v55  ;;  %886 = vmatmul.bf16.vlgmr.msrb.gmra.mxu3 %v838_v55 }
 0x1c8   :  { %1079 = vmatpush.bf16.msrb.mxu0 %v2326_v37  ;;  %1092 = vmatpush.bf16.msrb.mxu1 %v2328_v41 }
 0x1c9   :  { %1105 = vmatpush.bf16.msrb.mxu2 %v2330_v47  ;;  %1118 = vmatpush.bf16.msrb.mxu3 %v2335_v51 }
 0x1cc   :  { %1080 = vmatpush.bf16.msrb.mxu0 %v2333_v48  ;;  %1093 = vmatpush.bf16.msrb.mxu1 %v2338_v53 }
 0x1cd   :  { %1106 = vmatpush.bf16.msrb.mxu2 %v2341_v59  ;;  %1119 = vmatpush.bf16.msrb.mxu3 %v2347_v63 }
 0x1d0   :  { %1081 = vmatpush.bf16.msrb.mxu0 %v2345_v60  ;;  %1094 = vmatpush.bf16.msrb.mxu1 %v2350_v1 }
 0x1d1   :  { %1107 = vmatpush.bf16.msrb.mxu2 %v2353_v7  ;;  %1120 = vmatpush.bf16.msrb.mxu3 %v2359_v11 }
 0x1d4   :  { %1082 = vmatpush.bf16.msrb.mxu0 %v2357_v8  ;;  %1095 = vmatpush.bf16.msrb.mxu1 %v2362_v13 }
 0x1d5   :  { %1108 = vmatpush.bf16.msrb.mxu2 %v2368_v20  ;;  %1121 = vmatpush.bf16.msrb.mxu3 %v2374_v24 }
 0x1d8   :  { %1083 = vmatpush.bf16.msrb.mxu0 %v2372_v21  ;;  %1096 = vmatpush.bf16.msrb.mxu1 %v2377_v26 }
 0x1d9   :  { %1109 = vmatpush.bf16.msrb.mxu2 %v2380_v32  ;;  %1122 = vmatpush.bf16.msrb.mxu3 %v2386_v36 }
 0x1dc   :  { %1084 = vmatpush.bf16.msrb.mxu0 %v2384_v33  ;;  %1097 = vmatpush.bf16.msrb.mxu1 %v2389_v38 }
 0x1dd   :  { %1110 = vmatpush.bf16.msrb.mxu2 %v2392_v39  ;;  %1123 = vmatpush.bf16.msrb.mxu3 %v2401_v56 }
 0x1e0   :  { %1085 = vmatpush.bf16.msrb.mxu0 %v2396_v44  ;;  %1098 = vmatpush.bf16.msrb.mxu1 %v2399_v50 }
 0x1e1   :  { %1111 = vmatpush.bf16.msrb.mxu2 %v2404_v62  ;;  %1124 = vmatpush.bf16.msrb.mxu3 %v2410_v4 }
 0x1e4   :  { %1086 = vmatpush.bf16.msrb.mxu0 %v2408_v3  ;;  %1099 = vmatpush.bf16.msrb.mxu1 %v2413_v9 }
 0x1e5   :  { %1112 = vmatpush.bf16.msrb.mxu2 %v2416_v14  ;;  %1125 = vmatpush.bf16.msrb.mxu3 %v2420_v15 }
 0x243   :  { %v848_v46 = vpop.f32.mrf.mxu0  ;;  %v861_v6 = vpop.f32.mrf.mxu1 }
 0x244   :  { %v891_v58 = vadd.f32 %v848_v46, %v2519_v52  ;;  %v892_v35 = vadd.f32 %v861_v6, %v2866_v2 }
 0x246   :  { %v1937_v18 = vmul.f32 -1.442695, %v891_v58  ;;  %v1938_v16 = vmul.f32 -1.442695, %v892_v35 }
 0x248   :  { %2102 = vpow2.f32 %v1937_v18 }
 0x249   :  { %2104 = vpow2.f32 %v1938_v16 }
 0x24a   :  { %v874_v28 = vpop.f32.mrf.mxu2  ;;  %v887_v49 = vpop.f32.mrf.mxu3 }
 0x24b   :  { %v893_v27 = vadd.f32 %v874_v28, %v2867_v34  ;;  %v850_v45 = vpop.f32.mrf.mxu0  ;;  %v863_v25 = vpop.f32.mrf.mxu1  ;;  %v894_v30 = vadd.f32 %v887_v49, %v2868_v22 }
 0x24d   :  { %v1939_v17 = vmul.f32 -1.442695, %v893_v27 }
 0x24e   :  { %v2103_v57 = vpop.eup %2102 }
 0x24f   :  { %v2105_v0 = vpop.eup %2104  ;;  %v904_v42 = vadd.f32 1.0, %v2103_v57  ;;  %2106 = vpow2.f32 %v1939_v17 }
 0x250   :  { %v905_v40 = vadd.f32 1.0, %v2105_v0 }
 0x251   :  { %2108 = vrcp.f32 %v904_v42  ;;  %v918_v55 = vand.u32 2147483648, %v904_v42  ;;  %v916_v58 = vand.u32 2147483647, %v904_v42  ;;  %vm912_vm10 = vweird.f32 %v904_v42 }
 0x252   :  { %2110 = vrcp.f32 %v905_v40  ;;  %v876_v52 = vpop.f32.mrf.mxu2  ;;  %v889_v31 = vpop.f32.mrf.mxu3  ;;  %v933_v46 = vand.u32 2147483648, %v905_v40  ;;  %v931_v35 = vand.u32 2147483647, %v905_v40  ;;  %vm927_vm11 = vweird.f32 %v905_v40 }
 0x253   :  { %v919_v49 = vor.u32 1.1754944e-38, %v918_v55  ;;  %vm917_vm14 = vcmp.eq.f32.partialorder %v916_v58, 8.507059e+37  ;;  %v2870_v58 = vld [vmem:[#allocation15_spill] sm:$0xff] }
 0x254   :  { %v934_v27 = vor.u32 1.1754944e-38, %v933_v46  ;;  %vm932_vm15 = vcmp.eq.f32.partialorder %v931_v35, 8.507059e+37  ;;  %v2869_v46 = vld [vmem:[#allocation14_spill] sm:$0xff] }
 0x255   :  { %v2107_v61 = vpop.eup %2106 }
 0x256   :  { %v906_v10 = vadd.f32 1.0, %v2107_v61 }
 0x257   :  { %v2109_v29 = vpop.eup %2108 }
 0x258   :  { %v2111_v43 = vpop.eup %2110  ;;  %v908_v12 = vmul.f32 %v2109_v29, %v904_v42  ;;  %2112 = vrcp.f32 %v906_v10  ;;  %vm913_vm8 = vweird.f32 %v2109_v29  ;;  %vm942_vm1 = vweird.f32 %v906_v10 }
 0x259   :  { %v923_v5 = vmul.f32 %v2111_v43, %v905_v40  ;;  %2114 = vtanh.f32 %v894_v30  ;;  %vm928_vm9 = vweird.f32 %v2111_v43  ;;  %vm914_vm12 = vmor %vm912_vm10, %vm913_vm8  ;;  %v948_v30 = vand.u32 2147483648, %v906_v10 }
 0x25a   :  { %v909_v54 = vsub.f32 1.0, %v908_v12  ;;  %vm929_vm13 = vmor %vm927_vm11, %vm928_vm9 }
 0x25b   :  { %v924_v23 = vsub.f32 1.0, %v923_v5  ;;  %v949_v5 = vor.u32 1.1754944e-38, %v948_v30 }
 0x25c   :  { %v910_v6 = vmul.f32 %v2109_v29, %v909_v54 }
 0x25d   :  { %v925_v2 = vmul.f32 %v2111_v43, %v924_v23 }
 0x25e   :  { %v2113_v18 = vpop.eup %2112  ;;  %v911_v16 = vadd.f32 %v2109_v29, %v910_v6 }
 0x25f   :  { %v938_v28 = vmul.f32 %v2113_v18, %v906_v10  ;;  %v926_v34 = vadd.f32 %v2111_v43, %v925_v2  ;;  %v2115_v25 = vpop.eup %2114  ;;  %vm943_vm0 = vweird.f32 %v2113_v18 }
 0x260   :  { %v915_v45 = vsel %vm914_vm12, %v2109_v29, %v911_v16  ;;  %v946_v29 = vand.u32 2147483647, %v906_v10  ;;  %vm944_vm2 = vmor %vm942_vm1, %vm943_vm0 }
 0x261   :  { %v939_v17 = vsub.f32 1.0, %v938_v28  ;;  %v920_v57 = vsel %vm917_vm14, %v919_v49, %v915_v45  ;;  %v930_v0 = vsel %vm929_vm13, %v2111_v43, %v926_v34  ;;  %v2871_v49 = vld [vmem:[#allocation16_spill] sm:$0xff] }
 0x262   :  { %v935_v52 = vsel %vm932_vm15, %v934_v27, %v930_v0  ;;  %v954_v31 = vmul.f32 %v2115_v25, %v920_v57  ;;  %vm947_vm3 = vcmp.eq.f32.partialorder %v946_v29, 8.507059e+37  ;;  %v2872_v29 = vld [vmem:[#allocation17_spill] sm:$0xff] }
 0x263   :  { %v953_v61 = vmul.f32 %v935_v52, %v2630_v19  ;;  %v940_v22 = vmul.f32 %v2113_v18, %v939_v17 }
 0x265   :  { %v2670_v42 = vadd.f32 %v954_v31, %v953_v61  ;;  %v941_v40 = vadd.f32 %v2113_v18, %v940_v22 }
 0x267   :  { %2116 = vtanh.f32 %v2670_v42  ;;  %v945_v12 = vsel %vm944_vm2, %v2113_v18, %v941_v40 }
 0x268   :  { %v950_v54 = vsel %vm947_vm3, %v949_v5, %v945_v12 }
 0x26d   :  { %v2117_v43 = vpop.eup %2116 }
 0x26e   :  { %v957_v23 = vmul.f32 %v2117_v43, %v950_v54 }
 0x270   :  { %v958_v55 = vpack.c.bf16 %v957_v23, %v957_v23 }
 0x272   :  { %967 = vmatmul.bf16.vlgmr.msra.gmra.mxu0 %v958_v55  ;;  %980 = vmatmul.bf16.vlgmr.msra.gmra.mxu1 %v958_v55 }
 0x273   :  { %993 = vmatmul.bf16.vlgmr.msra.gmra.mxu2 %v958_v55  ;;  %1006 = vmatmul.bf16.vlgmr.msra.gmra.mxu3 %v958_v55 }
 0x274   :  { %1199 = vmatpush.bf16.msra.mxu0 %v2326_v37  ;;  %1212 = vmatpush.bf16.msra.mxu1 %v2328_v41 }
 0x275   :  { %1225 = vmatpush.bf16.msra.mxu2 %v2330_v47  ;;  %1238 = vmatpush.bf16.msra.mxu3 %v2335_v51 }
 0x278   :  { %1200 = vmatpush.bf16.msra.mxu0 %v2333_v48  ;;  %1213 = vmatpush.bf16.msra.mxu1 %v2338_v53 }
 0x279   :  { %1226 = vmatpush.bf16.msra.mxu2 %v2341_v59  ;;  %1239 = vmatpush.bf16.msra.mxu3 %v2347_v63 }
 0x27c   :  { %1201 = vmatpush.bf16.msra.mxu0 %v2345_v60  ;;  %1214 = vmatpush.bf16.msra.mxu1 %v2350_v1 }
 0x27d   :  { %1227 = vmatpush.bf16.msra.mxu2 %v2353_v7  ;;  %1240 = vmatpush.bf16.msra.mxu3 %v2359_v11 }
 0x280   :  { %1202 = vmatpush.bf16.msra.mxu0 %v2357_v8  ;;  %1215 = vmatpush.bf16.msra.mxu1 %v2362_v13 }
 0x281   :  { %1228 = vmatpush.bf16.msra.mxu2 %v2368_v20  ;;  %1241 = vmatpush.bf16.msra.mxu3 %v2374_v24 }
 0x284   :  { %1203 = vmatpush.bf16.msra.mxu0 %v2372_v21  ;;  %1216 = vmatpush.bf16.msra.mxu1 %v2377_v26 }
 0x285   :  { %1229 = vmatpush.bf16.msra.mxu2 %v2380_v32  ;;  %1242 = vmatpush.bf16.msra.mxu3 %v2386_v36 }
 0x288   :  { %1204 = vmatpush.bf16.msra.mxu0 %v2384_v33  ;;  %1217 = vmatpush.bf16.msra.mxu1 %v2389_v38 }
 0x289   :  { %1230 = vmatpush.bf16.msra.mxu2 %v2392_v39  ;;  %1243 = vmatpush.bf16.msra.mxu3 %v2401_v56 }
 0x28c   :  { %1205 = vmatpush.bf16.msra.mxu0 %v2396_v44  ;;  %1218 = vmatpush.bf16.msra.mxu1 %v2399_v50 }
 0x28d   :  { %1231 = vmatpush.bf16.msra.mxu2 %v2404_v62  ;;  %1244 = vmatpush.bf16.msra.mxu3 %v2410_v4 }
 0x290   :  { %1206 = vmatpush.bf16.msra.mxu0 %v2408_v3  ;;  %1219 = vmatpush.bf16.msra.mxu1 %v2413_v9 }
 0x291   :  { %1232 = vmatpush.bf16.msra.mxu2 %v2416_v14  ;;  %1245 = vmatpush.bf16.msra.mxu3 %v2420_v15 }
 0x2ef   :  { %v968_v19 = vpop.f32.mrf.mxu0  ;;  %v981_v10 = vpop.f32.mrf.mxu1 }
 0x2f0   :  { %v1011_v6 = vadd.f32 %v968_v19, %v2869_v46  ;;  %v1012_v2 = vadd.f32 %v981_v10, %v2870_v58 }
 0x2f2   :  { %v1940_v35 = vmul.f32 -1.442695, %v1011_v6  ;;  %v1941_v18 = vmul.f32 -1.442695, %v1012_v2 }
 0x2f4   :  { %2118 = vpow2.f32 %v1940_v35 }
 0x2f5   :  { %2120 = vpow2.f32 %v1941_v18 }
 0x2f6   :  { %v994_v16 = vpop.f32.mrf.mxu2  ;;  %v1007_v28 = vpop.f32.mrf.mxu3 }
 0x2f7   :  { %v1013_v34 = vadd.f32 %v994_v16, %v2871_v49  ;;  %v970_v27 = vpop.f32.mrf.mxu0  ;;  %v983_v45 = vpop.f32.mrf.mxu1  ;;  %v1014_v12 = vadd.f32 %v1007_v28, %v2872_v29 }
 0x2f9   :  { %v1942_v25 = vmul.f32 -1.442695, %v1013_v34 }
 0x2fa   :  { %v2119_v17 = vpop.eup %2118 }
 0x2fb   :  { %v2121_v57 = vpop.eup %2120  ;;  %v1024_v0 = vadd.f32 1.0, %v2119_v17  ;;  %2122 = vpow2.f32 %v1942_v25 }
 0x2fc   :  { %v1025_v52 = vadd.f32 1.0, %v2121_v57 }
 0x2fd   :  { %2124 = vrcp.f32 %v1024_v0  ;;  %v1038_v19 = vand.u32 2147483648, %v1024_v0  ;;  %v1036_v6 = vand.u32 2147483647, %v1024_v0  ;;  %vm1032_vm6 = vweird.f32 %v1024_v0 }
 0x2fe   :  { %2126 = vrcp.f32 %v1025_v52  ;;  %v996_v31 = vpop.f32.mrf.mxu2  ;;  %v1009_v61 = vpop.f32.mrf.mxu3  ;;  %v1053_v10 = vand.u32 2147483648, %v1025_v52  ;;  %v1051_v2 = vand.u32 2147483647, %v1025_v52  ;;  %vm1047_vm7 = vweird.f32 %v1025_v52 }
 0x2ff   :  { %v1039_v28 = vor.u32 1.1754944e-38, %v1038_v19  ;;  %vm1037_vm10 = vcmp.eq.f32.partialorder %v1036_v6, 8.507059e+37  ;;  %v2874_v6 = vld [vmem:[#allocation19_spill] sm:$0xff] }
 0x300   :  { %v1054_v34 = vor.u32 1.1754944e-38, %v1053_v10  ;;  %vm1052_vm11 = vcmp.eq.f32.partialorder %v1051_v2, 8.507059e+37  ;;  %v2873_v10 = vld [vmem:[#allocation18_spill] sm:$0xff] }
 0x301   :  { %v2123_v22 = vpop.eup %2122 }
 0x302   :  { %v1026_v40 = vadd.f32 1.0, %v2123_v22 }
 0x303   :  { %v2125_v30 = vpop.eup %2124 }
 0x304   :  { %v2127_v5 = vpop.eup %2126  ;;  %v1028_v43 = vmul.f32 %v2125_v30, %v1024_v0  ;;  %2128 = vrcp.f32 %v1026_v40  ;;  %vm1033_vm4 = vweird.f32 %v2125_v30  ;;  %vm1062_vm13 = vweird.f32 %v1026_v40 }
 0x305   :  { %v1043_v54 = vmul.f32 %v2127_v5, %v1025_v52  ;;  %2130 = vtanh.f32 %v1014_v12  ;;  %vm1048_vm5 = vweird.f32 %v2127_v5  ;;  %vm1034_vm8 = vmor %vm1032_vm6, %vm1033_vm4  ;;  %v1068_v12 = vand.u32 2147483648, %v1026_v40 }
 0x306   :  { %v1029_v23 = vsub.f32 1.0, %v1028_v43  ;;  %vm1049_vm9 = vmor %vm1047_vm7, %vm1048_vm5 }
 0x307   :  { %v1044_v55 = vsub.f32 1.0, %v1043_v54  ;;  %v1069_v54 = vor.u32 1.1754944e-38, %v1068_v12 }
 0x308   :  { %v1030_v46 = vmul.f32 %v2125_v30, %v1029_v23 }
 0x309   :  { %v1045_v58 = vmul.f32 %v2127_v5, %v1044_v55 }
 0x30a   :  { %v2129_v35 = vpop.eup %2128  ;;  %v1031_v18 = vadd.f32 %v2125_v30, %v1030_v46 }
 0x30b   :  { %v1058_v16 = vmul.f32 %v2129_v35, %v1026_v40  ;;  %v1046_v49 = vadd.f32 %v2127_v5, %v1045_v58  ;;  %v2131_v45 = vpop.eup %2130  ;;  %vm1063_vm12 = vweird.f32 %v2129_v35 }
 0x30c   :  { %v1035_v27 = vsel %vm1034_vm8, %v2125_v30, %v1031_v18  ;;  %v1066_v30 = vand.u32 2147483647, %v1026_v40  ;;  %vm1064_vm14 = vmor %vm1062_vm13, %vm1063_vm12 }
 0x30d   :  { %v1059_v25 = vsub.f32 1.0, %v1058_v16  ;;  %v1040_v17 = vsel %vm1037_vm10, %v1039_v28, %v1035_v27  ;;  %v1050_v57 = vsel %vm1049_vm9, %v2127_v5, %v1046_v49  ;;  %v2875_v28 = vld [vmem:[#allocation20_spill] sm:$0xff] }
 0x30e   :  { %v1055_v31 = vsel %vm1052_vm11, %v1054_v34, %v1050_v57  ;;  %v1074_v61 = vmul.f32 %v2131_v45, %v1040_v17  ;;  %vm1067_vm15 = vcmp.eq.f32.partialorder %v1066_v30, 8.507059e+37  ;;  %v2876_v30 = vld [vmem:[#allocation21_spill] sm:$0xff] }
 0x30f   :  { %v1073_v22 = vmul.f32 %v1055_v31, %v2670_v42  ;;  %v1060_v29 = vmul.f32 %v2129_v35, %v1059_v25 }
 0x311   :  { %v2710_v0 = vadd.f32 %v1074_v61, %v1073_v22  ;;  %v1061_v52 = vadd.f32 %v2129_v35, %v1060_v29 }
 0x313   :  { %2132 = vtanh.f32 %v2710_v0  ;;  %v1065_v43 = vsel %vm1064_vm14, %v2129_v35, %v1061_v52 }
 0x314   :  { %v1070_v23 = vsel %vm1067_vm15, %v1069_v54, %v1065_v43 }
 0x319   :  { %v2133_v5 = vpop.eup %2132 }
 0x31a   :  { %v1077_v55 = vmul.f32 %v2133_v5, %v1070_v23 }
 0x31c   :  { %v1078_v19 = vpack.c.bf16 %v1077_v55, %v1077_v55 }
 0x31e   :  { %1087 = vmatmul.bf16.vlgmr.msrb.gmra.mxu0 %v1078_v19  ;;  %1100 = vmatmul.bf16.vlgmr.msrb.gmra.mxu1 %v1078_v19 }
 0x31f   :  { %1113 = vmatmul.bf16.vlgmr.msrb.gmra.mxu2 %v1078_v19  ;;  %1126 = vmatmul.bf16.vlgmr.msrb.gmra.mxu3 %v1078_v19 }
 0x320   :  { %1319 = vmatpush.bf16.msrb.mxu0 %v2326_v37  ;;  %1332 = vmatpush.bf16.msrb.mxu1 %v2328_v41 }
 0x321   :  { %1345 = vmatpush.bf16.msrb.mxu2 %v2330_v47  ;;  %1358 = vmatpush.bf16.msrb.mxu3 %v2335_v51 }
 0x324   :  { %1320 = vmatpush.bf16.msrb.mxu0 %v2333_v48  ;;  %1333 = vmatpush.bf16.msrb.mxu1 %v2338_v53 }
 0x325   :  { %1346 = vmatpush.bf16.msrb.mxu2 %v2341_v59  ;;  %1359 = vmatpush.bf16.msrb.mxu3 %v2347_v63 }
 0x328   :  { %1321 = vmatpush.bf16.msrb.mxu0 %v2345_v60  ;;  %1334 = vmatpush.bf16.msrb.mxu1 %v2350_v1 }
 0x329   :  { %1347 = vmatpush.bf16.msrb.mxu2 %v2353_v7  ;;  %1360 = vmatpush.bf16.msrb.mxu3 %v2359_v11 }
 0x32c   :  { %1322 = vmatpush.bf16.msrb.mxu0 %v2357_v8  ;;  %1335 = vmatpush.bf16.msrb.mxu1 %v2362_v13 }
 0x32d   :  { %1348 = vmatpush.bf16.msrb.mxu2 %v2368_v20  ;;  %1361 = vmatpush.bf16.msrb.mxu3 %v2374_v24 }
 0x330   :  { %1323 = vmatpush.bf16.msrb.mxu0 %v2372_v21  ;;  %1336 = vmatpush.bf16.msrb.mxu1 %v2377_v26 }
 0x331   :  { %1349 = vmatpush.bf16.msrb.mxu2 %v2380_v32  ;;  %1362 = vmatpush.bf16.msrb.mxu3 %v2386_v36 }
 0x334   :  { %1324 = vmatpush.bf16.msrb.mxu0 %v2384_v33  ;;  %1337 = vmatpush.bf16.msrb.mxu1 %v2389_v38 }
 0x335   :  { %1350 = vmatpush.bf16.msrb.mxu2 %v2392_v39  ;;  %1363 = vmatpush.bf16.msrb.mxu3 %v2401_v56 }
 0x338   :  { %1325 = vmatpush.bf16.msrb.mxu0 %v2396_v44  ;;  %1338 = vmatpush.bf16.msrb.mxu1 %v2399_v50 }
 0x339   :  { %1351 = vmatpush.bf16.msrb.mxu2 %v2404_v62  ;;  %1364 = vmatpush.bf16.msrb.mxu3 %v2410_v4 }
 0x33c   :  { %1326 = vmatpush.bf16.msrb.mxu0 %v2408_v3  ;;  %1339 = vmatpush.bf16.msrb.mxu1 %v2413_v9 }
 0x33d   :  { %1352 = vmatpush.bf16.msrb.mxu2 %v2416_v14  ;;  %1365 = vmatpush.bf16.msrb.mxu3 %v2420_v15 }
 0x39b   :  { %v1088_v42 = vpop.f32.mrf.mxu0  ;;  %v1101_v40 = vpop.f32.mrf.mxu1 }
 0x39c   :  { %v1131_v46 = vadd.f32 %v1088_v42, %v2873_v10  ;;  %v1132_v58 = vadd.f32 %v1101_v40, %v2874_v6 }
 0x39e   :  { %v1943_v2 = vmul.f32 -1.442695, %v1131_v46  ;;  %v1944_v35 = vmul.f32 -1.442695, %v1132_v58 }
 0x3a0   :  { %2134 = vpow2.f32 %v1943_v2 }
 0x3a1   :  { %2136 = vpow2.f32 %v1944_v35 }
 0x3a2   :  { %v1114_v18 = vpop.f32.mrf.mxu2  ;;  %v1127_v16 = vpop.f32.mrf.mxu3 }
 0x3a3   :  { %v1133_v49 = vadd.f32 %v1114_v18, %v2875_v28  ;;  %v1090_v34 = vpop.f32.mrf.mxu0  ;;  %v1103_v27 = vpop.f32.mrf.mxu1  ;;  %v1134_v43 = vadd.f32 %v1127_v16, %v2876_v30 }
 0x3a5   :  { %v1945_v45 = vmul.f32 -1.442695, %v1133_v49 }
 0x3a6   :  { %v2135_v25 = vpop.eup %2134 }
 0x3a7   :  { %v2137_v17 = vpop.eup %2136  ;;  %v1144_v57 = vadd.f32 1.0, %v2135_v25  ;;  %2138 = vpow2.f32 %v1945_v45 }
 0x3a8   :  { %v1145_v31 = vadd.f32 1.0, %v2137_v17 }
 0x3a9   :  { %2140 = vrcp.f32 %v1144_v57  ;;  %v1158_v42 = vand.u32 2147483648, %v1144_v57  ;;  %v1156_v46 = vand.u32 2147483647, %v1144_v57  ;;  %vm1152_vm2 = vweird.f32 %v1144_v57 }
 0x3aa   :  { %2142 = vrcp.f32 %v1145_v31  ;;  %v1116_v61 = vpop.f32.mrf.mxu2  ;;  %v1129_v22 = vpop.f32.mrf.mxu3  ;;  %v1173_v40 = vand.u32 2147483648, %v1145_v31  ;;  %v1171_v58 = vand.u32 2147483647, %v1145_v31  ;;  %vm1167_vm3 = vweird.f32 %v1145_v31 }
 0x3ab   :  { %v1159_v16 = vor.u32 1.1754944e-38, %v1158_v42  ;;  %vm1157_vm6 = vcmp.eq.f32.partialorder %v1156_v46, 8.507059e+37 }
 0x3ac   :  { %v1174_v49 = vor.u32 1.1754944e-38, %v1173_v40  ;;  %vm1172_vm7 = vcmp.eq.f32.partialorder %v1171_v58, 8.507059e+37 }
 0x3ad   :  { %v2139_v29 = vpop.eup %2138 }
 0x3ae   :  { %v1146_v52 = vadd.f32 1.0, %v2139_v29 }
 0x3af   :  { %v2141_v12 = vpop.eup %2140 }
 0x3b0   :  { %v2143_v54 = vpop.eup %2142  ;;  %v1148_v5 = vmul.f32 %v2141_v12, %v1144_v57  ;;  %2144 = vrcp.f32 %v1146_v52  ;;  %vm1153_vm0 = vweird.f32 %v2141_v12  ;;  %vm1182_vm9 = vweird.f32 %v1146_v52 }
 0x3b1   :  { %v1163_v23 = vmul.f32 %v2143_v54, %v1145_v31  ;;  %2146 = vtanh.f32 %v1134_v43  ;;  %vm1168_vm1 = vweird.f32 %v2143_v54  ;;  %vm1154_vm4 = vmor %vm1152_vm2, %vm1153_vm0  ;;  %v1188_v43 = vand.u32 2147483648, %v1146_v52 }
 0x3b2   :  { %v1149_v55 = vsub.f32 1.0, %v1148_v5  ;;  %vm1169_vm5 = vmor %vm1167_vm3, %vm1168_vm1 }
 0x3b3   :  { %v1164_v19 = vsub.f32 1.0, %v1163_v23  ;;  %v1189_v23 = vor.u32 1.1754944e-38, %v1188_v43 }
 0x3b4   :  { %v1150_v10 = vmul.f32 %v2141_v12, %v1149_v55 }
 0x3b5   :  { %v1165_v6 = vmul.f32 %v2143_v54, %v1164_v19 }
 0x3b6   :  { %v2145_v2 = vpop.eup %2144  ;;  %v1151_v35 = vadd.f32 %v2141_v12, %v1150_v10 }
 0x3b7   :  { %v1178_v18 = vmul.f32 %v2145_v2, %v1146_v52  ;;  %v1166_v28 = vadd.f32 %v2143_v54, %v1165_v6  ;;  %v2147_v27 = vpop.eup %2146  ;;  %vm1183_vm8 = vweird.f32 %v2145_v2 }
 0x3b8   :  { %v1155_v34 = vsel %vm1154_vm4, %v2141_v12, %v1151_v35  ;;  %v1186_v12 = vand.u32 2147483647, %v1146_v52  ;;  %vm1184_vm10 = vmor %vm1182_vm9, %vm1183_vm8 }
 0x3b9   :  { %v1179_v45 = vsub.f32 1.0, %v1178_v18  ;;  %v1160_v25 = vsel %vm1157_vm6, %v1159_v16, %v1155_v34  ;;  %v1170_v17 = vsel %vm1169_vm5, %v2143_v54, %v1166_v28 }
 0x3ba   :  { %v1175_v61 = vsel %vm1172_vm7, %v1174_v49, %v1170_v17  ;;  %v1194_v22 = vmul.f32 %v2147_v27, %v1160_v25  ;;  %vm1187_vm11 = vcmp.eq.f32.partialorder %v1186_v12, 8.507059e+37 }
 0x3bb   :  { %v1193_v29 = vmul.f32 %v1175_v61, %v2710_v0  ;;  %v1180_v30 = vmul.f32 %v2145_v2, %v1179_v45 }
 0x3bd   :  { %v2750_v57 = vadd.f32 %v1194_v22, %v1193_v29  ;;  %v1181_v31 = vadd.f32 %v2145_v2, %v1180_v30 }
 0x3bf   :  { %2148 = vtanh.f32 %v2750_v57  ;;  %v1185_v5 = vsel %vm1184_vm10, %v2145_v2, %v1181_v31 }
 0x3c0   :  { %v1190_v55 = vsel %vm1187_vm11, %v1189_v23, %v1185_v5 }
 0x3c5   :  { %v2149_v54 = vpop.eup %2148 }
 0x3c6   :  { %v1197_v19 = vmul.f32 %v2149_v54, %v1190_v55 }
 0x3c8   :  { %v1198_v42 = vpack.c.bf16 %v1197_v19, %v1197_v19 }
 0x3ca   :  { %1207 = vmatmul.bf16.vlgmr.msra.gmra.mxu0 %v1198_v42  ;;  %1220 = vmatmul.bf16.vlgmr.msra.gmra.mxu1 %v1198_v42 }
 0x3cb   :  { %1233 = vmatmul.bf16.vlgmr.msra.gmra.mxu2 %v1198_v42  ;;  %1246 = vmatmul.bf16.vlgmr.msra.gmra.mxu3 %v1198_v42 }
 0x3cc   :  { %1439 = vmatpush.bf16.msra.mxu0 %v2326_v37  ;;  %1452 = vmatpush.bf16.msra.mxu1 %v2328_v41 }
 0x3cd   :  { %1465 = vmatpush.bf16.msra.mxu2 %v2330_v47  ;;  %1478 = vmatpush.bf16.msra.mxu3 %v2335_v51  ;;  %v2877_v47 = vld [vmem:[#allocation22_spill] sm:$0xff]  ;;  %v2878_v51 = vld [vmem:[#allocation23_spill] sm:$0xff] }
 0x3d0   :  { %1440 = vmatpush.bf16.msra.mxu0 %v2333_v48  ;;  %1453 = vmatpush.bf16.msra.mxu1 %v2338_v53 }
 0x3d1   :  { %1466 = vmatpush.bf16.msra.mxu2 %v2341_v59  ;;  %1479 = vmatpush.bf16.msra.mxu3 %v2347_v63 }
 0x3d4   :  { %1441 = vmatpush.bf16.msra.mxu0 %v2345_v60  ;;  %1454 = vmatpush.bf16.msra.mxu1 %v2350_v1 }
 0x3d5   :  { %1467 = vmatpush.bf16.msra.mxu2 %v2353_v7  ;;  %1480 = vmatpush.bf16.msra.mxu3 %v2359_v11  ;;  %v2879_v7 = vld [vmem:[#allocation24_spill] sm:$0xff] }
 0x3d8   :  { %1442 = vmatpush.bf16.msra.mxu0 %v2357_v8  ;;  %1455 = vmatpush.bf16.msra.mxu1 %v2362_v13 }
 0x3d9   :  { %1468 = vmatpush.bf16.msra.mxu2 %v2368_v20  ;;  %1481 = vmatpush.bf16.msra.mxu3 %v2374_v24 }
 0x3dc   :  { %1443 = vmatpush.bf16.msra.mxu0 %v2372_v21  ;;  %1456 = vmatpush.bf16.msra.mxu1 %v2377_v26 }
 0x3dd   :  { %1469 = vmatpush.bf16.msra.mxu2 %v2380_v32  ;;  %1482 = vmatpush.bf16.msra.mxu3 %v2386_v36 }
 0x3e0   :  { %1444 = vmatpush.bf16.msra.mxu0 %v2384_v33  ;;  %1457 = vmatpush.bf16.msra.mxu1 %v2389_v38 }
 0x3e1   :  { %1470 = vmatpush.bf16.msra.mxu2 %v2392_v39  ;;  %1483 = vmatpush.bf16.msra.mxu3 %v2401_v56 }
 0x3e4   :  { %1445 = vmatpush.bf16.msra.mxu0 %v2396_v44  ;;  %1458 = vmatpush.bf16.msra.mxu1 %v2399_v50  ;;  %v2880_v50 = vld [vmem:[#allocation25_spill] sm:$0xff] }
 0x3e5   :  { %1471 = vmatpush.bf16.msra.mxu2 %v2404_v62  ;;  %1484 = vmatpush.bf16.msra.mxu3 %v2410_v4 }
 0x3e8   :  { %1446 = vmatpush.bf16.msra.mxu0 %v2408_v3  ;;  %1459 = vmatpush.bf16.msra.mxu1 %v2413_v9 }
 0x3e9   :  { %1472 = vmatpush.bf16.msra.mxu2 %v2416_v14  ;;  %1485 = vmatpush.bf16.msra.mxu3 %v2420_v15 }
 0x447   :  { %v1208_v37 = vpop.f32.mrf.mxu0  ;;  %v1221_v41 = vpop.f32.mrf.mxu1 }
 0x448   :  { %v1251_v48 = vadd.f32 %v1208_v37, %v2877_v47  ;;  %v1252_v53 = vadd.f32 %v1221_v41, %v2878_v51  ;;  %v2881_v37 = vld [vmem:[#allocation26_spill] sm:$0xff]  ;;  %v2882_v47 = vld [vmem:[#allocation27_spill] sm:$0xff] }
 0x44a   :  { %v1946_v59 = vmul.f32 -1.442695, %v1251_v48  ;;  %v1947_v60 = vmul.f32 -1.442695, %v1252_v53 }
 0x44c   :  { %2150 = vpow2.f32 %v1946_v59 }
 0x44d   :  { %2152 = vpow2.f32 %v1947_v60 }
 0x44e   :  { %v1234_v63 = vpop.f32.mrf.mxu2  ;;  %v1247_v1 = vpop.f32.mrf.mxu3 }
 0x44f   :  { %v1253_v8 = vadd.f32 %v1234_v63, %v2879_v7  ;;  %v1210_v11 = vpop.f32.mrf.mxu0  ;;  %v1223_v13 = vpop.f32.mrf.mxu1  ;;  %v1254_v56 = vadd.f32 %v1247_v1, %v2880_v50  ;;  %v2883_v63 = vld [vmem:[#allocation28_spill] sm:$0xff] }
 0x451   :  { %v1948_v20 = vmul.f32 -1.442695, %v1253_v8 }
 0x452   :  { %v2151_v21 = vpop.eup %2150 }
 0x453   :  { %v2153_v24 = vpop.eup %2152  ;;  %v1264_v26 = vadd.f32 1.0, %v2151_v21  ;;  %2154 = vpow2.f32 %v1948_v20 }
 0x454   :  { %v1265_v32 = vadd.f32 1.0, %v2153_v24 }
 0x455   :  { %2156 = vrcp.f32 %v1264_v26  ;;  %v1278_v15 = vand.u32 2147483648, %v1264_v26  ;;  %v1276_v40 = vand.u32 2147483647, %v1264_v26  ;;  %vm1272_vm14 = vweird.f32 %v1264_v26 }
 0x456   :  { %2158 = vrcp.f32 %v1265_v32  ;;  %v1236_v33 = vpop.f32.mrf.mxu2  ;;  %v1249_v36 = vpop.f32.mrf.mxu3  ;;  %v1293_v0 = vand.u32 2147483648, %v1265_v32  ;;  %v1291_v46 = vand.u32 2147483647, %v1265_v32  ;;  %vm1287_vm15 = vweird.f32 %v1265_v32 }
 0x457   :  { %v1279_v35 = vor.u32 1.1754944e-38, %v1278_v15  ;;  %vm1277_vm2 = vcmp.eq.f32.partialorder %v1276_v40, 8.507059e+37 }
 0x458   :  { %v1294_v16 = vor.u32 1.1754944e-38, %v1293_v0  ;;  %vm1292_vm3 = vcmp.eq.f32.partialorder %v1291_v46, 8.507059e+37 }
 0x459   :  { %v2155_v38 = vpop.eup %2154 }
 0x45a   :  { %v1266_v39 = vadd.f32 1.0, %v2155_v38 }
 0x45b   :  { %v2157_v44 = vpop.eup %2156 }
 0x45c   :  { %v2159_v62 = vpop.eup %2158  ;;  %v1268_v3 = vmul.f32 %v2157_v44, %v1264_v26  ;;  %2160 = vrcp.f32 %v1266_v39  ;;  %vm1273_vm12 = vweird.f32 %v2157_v44  ;;  %v1308_v31 = vand.u32 2147483648, %v1266_v39 }
 0x45d   :  { %v1283_v4 = vmul.f32 %v2159_v62, %v1265_v32  ;;  %2162 = vtanh.f32 %v1254_v56  ;;  %vm1288_vm13 = vweird.f32 %v2159_v62  ;;  %vm1274_vm0 = vmor %vm1272_vm14, %vm1273_vm12  ;;  %vm1302_vm5 = vweird.f32 %v1266_v39 }
 0x45e   :  { %v1269_v9 = vsub.f32 1.0, %v1268_v3  ;;  %vm1289_vm1 = vmor %vm1287_vm15, %vm1288_vm13  ;;  %v1306_v43 = vand.u32 2147483647, %v1266_v39  ;;  %v1309_v5 = vor.u32 1.1754944e-38, %v1308_v31 }
 0x45f   :  { %v1284_v14 = vsub.f32 1.0, %v1283_v4 }
 0x460   :  { %v1270_v52 = vmul.f32 %v2157_v44, %v1269_v9  ;;  %vm1307_vm7 = vcmp.eq.f32.partialorder %v1306_v43, 8.507059e+37 }
 0x461   :  { %v1285_v10 = vmul.f32 %v2159_v62, %v1284_v14 }
 0x462   :  { %v2161_v6 = vpop.eup %2160  ;;  %v1271_v58 = vadd.f32 %v2157_v44, %v1270_v52 }
 0x463   :  { %v1298_v2 = vmul.f32 %v2161_v6, %v1266_v39  ;;  %v1286_v18 = vadd.f32 %v2159_v62, %v1285_v10  ;;  %v2163_v49 = vpop.eup %2162  ;;  %vm1303_vm4 = vweird.f32 %v2161_v6  ;;  %v2884_v39 = vld [vmem:[#allocation29_spill] sm:$0xff] }
 0x464   :  { %v1275_v28 = vsel %vm1274_vm0, %v2157_v44, %v1271_v58  ;;  %vm1304_vm6 = vmor %vm1302_vm5, %vm1303_vm4 }
 0x465   :  { %v1299_v34 = vsub.f32 1.0, %v1298_v2  ;;  %v1280_v27 = vsel %vm1277_vm2, %v1279_v35, %v1275_v28  ;;  %v1290_v45 = vsel %vm1289_vm1, %v2159_v62, %v1286_v18 }
 0x466   :  { %v1295_v25 = vsel %vm1292_vm3, %v1294_v16, %v1290_v45  ;;  %v1314_v17 = vmul.f32 %v2163_v49, %v1280_v27 }
 0x467   :  { %v1313_v61 = vmul.f32 %v1295_v25, %v2750_v57  ;;  %v1300_v22 = vmul.f32 %v2161_v6, %v1299_v34 }
 0x469   :  { %v2790_v29 = vadd.f32 %v1314_v17, %v1313_v61  ;;  %v1301_v30 = vadd.f32 %v2161_v6, %v1300_v22 }
 0x46b   :  { %2164 = vtanh.f32 %v2790_v29  ;;  %v1305_v12 = vsel %vm1304_vm6, %v2161_v6, %v1301_v30 }
 0x46c   :  { %v1310_v54 = vsel %vm1307_vm7, %v1309_v5, %v1305_v12 }
 0x471   :  { %v2165_v23 = vpop.eup %2164 }
 0x472   :  { %v1317_v55 = vmul.f32 %v2165_v23, %v1310_v54 }
 0x474   :  { %v1318_v19 = vpack.c.bf16 %v1317_v55, %v1317_v55 }
 0x476   :  { %1327 = vmatmul.bf16.vlgmr.msrb.gmra.mxu0 %v1318_v19  ;;  %1340 = vmatmul.bf16.vlgmr.msrb.gmra.mxu1 %v1318_v19 }
 0x477   :  { %1353 = vmatmul.bf16.vlgmr.msrb.gmra.mxu2 %v1318_v19  ;;  %1366 = vmatmul.bf16.vlgmr.msrb.gmra.mxu3 %v1318_v19  ;;  %v2061_v19 = vld [vmem:[%s2840_s4 + $0x30] sm:$0xff] }
 0x4f3   :  { %v1328_v57 = vpop.f32.mrf.mxu0  ;;  %v1341_v42 = vpop.f32.mrf.mxu1 }
 0x4f4   :  { %v1371_v41 = vadd.f32 %v1328_v57, %v2881_v37  ;;  %v1372_v48 = vadd.f32 %v1341_v42, %v2882_v47  ;;  %v2060_v57 = vld [vmem:[%s2840_s4 + $0x28] sm:$0xff]  ;;  %v2059_v42 = vld [vmem:[%s2840_s4 + $0x20] sm:$0xff]  ;;  %v2058_v37 = vld [vmem:[%s2840_s4 + $0x18] sm:$0xff] }
 0x4f6   :  { %v1949_v51 = vmul.f32 -1.442695, %v1371_v41  ;;  %v1950_v53 = vmul.f32 -1.442695, %v1372_v48  ;;  %v2885_v48 = vld [vmem:[#allocation30_spill] sm:$0xff] }
 0x4f8   :  { %2166 = vpow2.f32 %v1949_v51 }
 0x4f9   :  { %2168 = vpow2.f32 %v1950_v53  ;;  %v2886_v53 = vld [vmem:[#allocation31_spill] sm:$0xff] }
 0x4fa   :  { %v1354_v59 = vpop.f32.mrf.mxu2  ;;  %v1367_v60 = vpop.f32.mrf.mxu3 }
 0x4fb   :  { %v1373_v1 = vadd.f32 %v1354_v59, %v2883_v63  ;;  %v1330_v7 = vpop.f32.mrf.mxu0  ;;  %v1343_v8 = vpop.f32.mrf.mxu1  ;;  %v1374_v44 = vadd.f32 %v1367_v60, %v2884_v39 }
 0x4fc   :  { %v2056_v7 = vld [vmem:[%s2840_s4 + $0x8] sm:$0xff] }
 0x4fd   :  { %v1951_v11 = vmul.f32 -1.442695, %v1373_v1  ;;  %v2057_v1 = vld [vmem:[%s2840_s4 + $0x10] sm:$0xff] }
 0x4fe   :  { %v2167_v13 = vpop.eup %2166 }
 0x4ff   :  { %v2169_v20 = vpop.eup %2168  ;;  %v1384_v21 = vadd.f32 1.0, %v2167_v13  ;;  %2170 = vpow2.f32 %v1951_v11  ;;  %v2887_v13 = vld [vmem:[#allocation32_spill] sm:$0xff] }
 0x500   :  { %v1385_v24 = vadd.f32 1.0, %v2169_v20 }
 0x501   :  { %2172 = vrcp.f32 %v1384_v21  ;;  %v1398_v9 = vand.u32 2147483648, %v1384_v21  ;;  %v1396_v0 = vand.u32 2147483647, %v1384_v21  ;;  %vm1392_vm10 = vweird.f32 %v1384_v21 }
 0x502   :  { %2174 = vrcp.f32 %v1385_v24  ;;  %v1356_v26 = vpop.f32.mrf.mxu2  ;;  %v1369_v32 = vpop.f32.mrf.mxu3  ;;  %v1413_v14 = vand.u32 2147483648, %v1385_v24  ;;  %v1411_v40 = vand.u32 2147483647, %v1385_v24  ;;  %vm1407_vm11 = vweird.f32 %v1385_v24 }
 0x503   :  { %v1399_v58 = vor.u32 1.1754944e-38, %v1398_v9  ;;  %vm1397_vm14 = vcmp.eq.f32.partialorder %v1396_v0, 8.507059e+37  ;;  %v2055_v26 = vld [vmem:[%s2840_s4] sm:$0xff] }
 0x504   :  { %v1414_v35 = vor.u32 1.1754944e-38, %v1413_v14  ;;  %vm1412_vm15 = vcmp.eq.f32.partialorder %v1411_v40, 8.507059e+37 }
 0x505   :  { %v2171_v33 = vpop.eup %2170 }
 0x506   :  { %v1386_v36 = vadd.f32 1.0, %v2171_v33 }
 0x507   :  { %v2173_v38 = vpop.eup %2172 }
 0x508   :  { %v2175_v50 = vpop.eup %2174  ;;  %v1388_v56 = vmul.f32 %v2173_v38, %v1384_v21  ;;  %2176 = vrcp.f32 %v1386_v36  ;;  %vm1393_vm8 = vweird.f32 %v2173_v38  ;;  %v1428_v30 = vand.u32 2147483648, %v1386_v36 }
 0x509   :  { %v1403_v62 = vmul.f32 %v2175_v50, %v1385_v24  ;;  %2178 = vtanh.f32 %v1374_v44  ;;  %vm1408_vm9 = vweird.f32 %v2175_v50  ;;  %vm1394_vm12 = vmor %vm1392_vm10, %vm1393_vm8  ;;  %vm1422_vm1 = vweird.f32 %v1386_v36 }
 0x50a   :  { %v1389_v3 = vsub.f32 1.0, %v1388_v56  ;;  %vm1409_vm13 = vmor %vm1407_vm11, %vm1408_vm9  ;;  %v1426_v31 = vand.u32 2147483647, %v1386_v36  ;;  %v1429_v12 = vor.u32 1.1754944e-38, %v1428_v30 }
 0x50b   :  { %v1404_v4 = vsub.f32 1.0, %v1403_v62 }
 0x50c   :  { %v1390_v15 = vmul.f32 %v2173_v38, %v1389_v3  ;;  %vm1427_vm3 = vcmp.eq.f32.partialorder %v1426_v31, 8.507059e+37 }
 0x50d   :  { %v1405_v52 = vmul.f32 %v2175_v50, %v1404_v4  ;;  %v2888_v4 = vld [vmem:[#allocation33_spill] sm:$0xff] }
 0x50e   :  { %v2177_v10 = vpop.eup %2176  ;;  %v1391_v46 = vadd.f32 %v2173_v38, %v1390_v15 }
 0x50f   :  { %v1418_v6 = vmul.f32 %v2177_v10, %v1386_v36  ;;  %v1406_v2 = vadd.f32 %v2175_v50, %v1405_v52  ;;  %v2179_v16 = vpop.eup %2178  ;;  %vm1423_vm0 = vweird.f32 %v2177_v10 }
 0x510   :  { %v1395_v18 = vsel %vm1394_vm12, %v2173_v38, %v1391_v46  ;;  %vm1424_vm2 = vmor %vm1422_vm1, %vm1423_vm0 }
 0x511   :  { %v1419_v28 = vsub.f32 1.0, %v1418_v6  ;;  %v1400_v49 = vsel %vm1397_vm14, %v1399_v58, %v1395_v18  ;;  %v1410_v34 = vsel %vm1409_vm13, %v2175_v50, %v1406_v2 }
 0x512   :  { %v1415_v27 = vsel %vm1412_vm15, %v1414_v35, %v1410_v34  ;;  %v1434_v45 = vmul.f32 %v2179_v16, %v1400_v49 }
 0x513   :  { %v1433_v25 = vmul.f32 %v1415_v27, %v2790_v29  ;;  %v1420_v17 = vmul.f32 %v2177_v10, %v1419_v28  ;;  %v2062_v29 = vld [vmem:[%s2840_s4 + $0x38] sm:$0xff] }
 0x514   :  { %1627 = vmatpush.bf16.msrb.mxu0 %v2062_v29 }
 0x515   :  { %v2798_v61 = vadd.f32 %v1434_v45, %v1433_v25  ;;  %v1421_v22 = vadd.f32 %v2177_v10, %v1420_v17 }
 0x517   :  { %2180 = vtanh.f32 %v2798_v61  ;;  %v1425_v43 = vsel %vm1424_vm2, %v2177_v10, %v1421_v22 }
 0x518   :  { %v1430_v23 = vsel %vm1427_vm3, %v1429_v12, %v1425_v43  ;;  %1628 = vmatpush.bf16.msrb.mxu0 %v2061_v19 }
 0x51c   :  { %1629 = vmatpush.bf16.msrb.mxu0 %v2060_v57 }
 0x51d   :  { %v2181_v5 = vpop.eup %2180 }
 0x51e   :  { %v1437_v54 = vmul.f32 %v2181_v5, %v1430_v23 }
 0x520   :  { %v1438_v55 = vpack.c.bf16 %v1437_v54, %v1437_v54  ;;  %1630 = vmatpush.bf16.msrb.mxu0 %v2059_v42 }
 0x522   :  { %1447 = vmatmul.bf16.vlgmr.msra.gmra.mxu0 %v1438_v55  ;;  %1460 = vmatmul.bf16.vlgmr.msra.gmra.mxu1 %v1438_v55 }
 0x523   :  { %1473 = vmatmul.bf16.vlgmr.msra.gmra.mxu2 %v1438_v55  ;;  %1486 = vmatmul.bf16.vlgmr.msra.gmra.mxu3 %v1438_v55 }
 0x524   :  { %1631 = vmatpush.bf16.msrb.mxu0 %v2058_v37 }
 0x528   :  { %1632 = vmatpush.bf16.msrb.mxu0 %v2057_v1 }
 0x52c   :  { %1633 = vmatpush.bf16.msrb.mxu0 %v2056_v7 }
 0x530   :  { %1634 = vmatpush.bf16.msrb.mxu0 %v2055_v26 }
 0x59f   :  { %v1448_v41 = vpop.f32.mrf.mxu0  ;;  %v1461_v47 = vpop.f32.mrf.mxu1 }
 0x5a0   :  { %v1491_v51 = vadd.f32 %v1448_v41, %v2885_v48  ;;  %v1492_v59 = vadd.f32 %v1461_v47, %v2886_v53 }
 0x5a2   :  { %v1952_v60 = vmul.f32 -1.442695, %v1491_v51  ;;  %v1953_v63 = vmul.f32 -1.442695, %v1492_v59 }
 0x5a4   :  { %2182 = vpow2.f32 %v1952_v60 }
 0x5a5   :  { %2184 = vpow2.f32 %v1953_v63 }
 0x5a6   :  { %v1474_v8 = vpop.f32.mrf.mxu2  ;;  %v1487_v11 = vpop.f32.mrf.mxu3 }
 0x5a7   :  { %v1493_v20 = vadd.f32 %v1474_v8, %v2887_v13  ;;  %v1450_v21 = vpop.f32.mrf.mxu0  ;;  %v1463_v24 = vpop.f32.mrf.mxu1  ;;  %v1494_v9 = vadd.f32 %v1487_v11, %v2888_v4 }
 0x5a9   :  { %v1954_v32 = vmul.f32 -1.442695, %v1493_v20 }
 0x5aa   :  { %v2183_v33 = vpop.eup %2182 }
 0x5ab   :  { %v2185_v36 = vpop.eup %2184  ;;  %v1504_v38 = vadd.f32 1.0, %v2183_v33  ;;  %2186 = vpow2.f32 %v1954_v32 }
 0x5ac   :  { %v1505_v39 = vadd.f32 1.0, %v2185_v36 }
 0x5ad   :  { %2188 = vrcp.f32 %v1504_v38  ;;  %v1518_v10 = vand.u32 2147483648, %v1504_v38  ;;  %v1516_v58 = vand.u32 2147483647, %v1504_v38  ;;  %vm1512_vm6 = vweird.f32 %v1504_v38 }
 0x5ae   :  { %2190 = vrcp.f32 %v1505_v39  ;;  %v1476_v44 = vpop.f32.mrf.mxu2  ;;  %v1489_v50 = vpop.f32.mrf.mxu3  ;;  %v1533_v46 = vand.u32 2147483648, %v1505_v39  ;;  %v1531_v35 = vand.u32 2147483647, %v1505_v39  ;;  %vm1527_vm7 = vweird.f32 %v1505_v39 }
 0x5af   :  { %v1519_v49 = vor.u32 1.1754944e-38, %v1518_v10  ;;  %vm1517_vm10 = vcmp.eq.f32.partialorder %v1516_v58, 8.507059e+37 }
 0x5b0   :  { %v1534_v27 = vor.u32 1.1754944e-38, %v1533_v46  ;;  %vm1532_vm11 = vcmp.eq.f32.partialorder %v1531_v35, 8.507059e+37 }
 0x5b1   :  { %v2187_v56 = vpop.eup %2186 }
 0x5b2   :  { %v1506_v62 = vadd.f32 1.0, %v2187_v56 }
 0x5b3   :  { %v2189_v3 = vpop.eup %2188 }
 0x5b4   :  { %v2191_v14 = vpop.eup %2190  ;;  %v1508_v15 = vmul.f32 %v2189_v3, %v1504_v38  ;;  %2192 = vrcp.f32 %v1506_v62  ;;  %vm1513_vm4 = vweird.f32 %v2189_v3  ;;  %v1548_v55 = vand.u32 2147483648, %v1506_v62 }
 0x5b5   :  { %v1523_v0 = vmul.f32 %v2191_v14, %v1505_v39  ;;  %2194 = vtanh.f32 %v1494_v9  ;;  %vm1528_vm5 = vweird.f32 %v2191_v14  ;;  %vm1514_vm8 = vmor %vm1512_vm6, %vm1513_vm4  ;;  %vm1542_vm13 = vweird.f32 %v1506_v62 }
 0x5b6   :  { %v1509_v52 = vsub.f32 1.0, %v1508_v15  ;;  %vm1529_vm9 = vmor %vm1527_vm7, %vm1528_vm5  ;;  %v1546_v29 = vand.u32 2147483647, %v1506_v62  ;;  %v1549_v57 = vor.u32 1.1754944e-38, %v1548_v55 }
 0x5b7   :  { %v1524_v40 = vsub.f32 1.0, %v1523_v0 }
 0x5b8   :  { %v1510_v6 = vmul.f32 %v2189_v3, %v1509_v52  ;;  %vm1547_vm15 = vcmp.eq.f32.partialorder %v1546_v29, 8.507059e+37 }
 0x5b9   :  { %v1525_v2 = vmul.f32 %v2191_v14, %v1524_v40 }
 0x5ba   :  { %v2193_v18 = vpop.eup %2192  ;;  %v1511_v16 = vadd.f32 %v2189_v3, %v1510_v6 }
 0x5bb   :  { %v1538_v28 = vmul.f32 %v2193_v18, %v1506_v62  ;;  %v1526_v34 = vadd.f32 %v2191_v14, %v1525_v2  ;;  %v2195_v25 = vpop.eup %2194  ;;  %vm1543_vm12 = vweird.f32 %v2193_v18 }
 0x5bc   :  { %v1515_v45 = vsel %vm1514_vm8, %v2189_v3, %v1511_v16  ;;  %vm1544_vm14 = vmor %vm1542_vm13, %vm1543_vm12 }
 0x5bd   :  { %v1539_v17 = vsub.f32 1.0, %v1538_v28  ;;  %v1520_v22 = vsel %vm1517_vm10, %v1519_v49, %v1515_v45  ;;  %v1530_v30 = vsel %vm1529_vm9, %v2191_v14, %v1526_v34 }
 0x5be   :  { %v1535_v31 = vsel %vm1532_vm11, %v1534_v27, %v1530_v30  ;;  %v1554_v43 = vmul.f32 %v2195_v25, %v1520_v22 }
 0x5bf   :  { %v1540_v12 = vmul.f32 %v2193_v18, %v1539_v17  ;;  %v1553_v5 = vmul.f32 %v1535_v31, %v2798_v61  ;;  %v2069_v61 = vld [vmem:[%s2841_s5] ss:$0 sm:$0xff] }
 0x5c1   :  { %v1555_v23 = vadd.f32 %v1554_v43, %v1553_v5  ;;  %v1541_v54 = vadd.f32 %v2193_v18, %v1540_v12 }
 0x5c3   :  { %2196 = vtanh.f32 %v1555_v23  ;;  %v1545_v19 = vsel %vm1544_vm14, %v2193_v18, %v1541_v54 }
 0x5c4   :  { %v1550_v37 = vsel %vm1547_vm15, %v1549_v57, %v1545_v19 }
 0x5c9   :  { %v2197_v42 = vpop.eup %2196 }
 0x5ca   :  { %v1557_v41 = vmul.f32 %v2197_v42, %v1550_v37 }
 0x5cc   :  { %v1558_v47 = vpack.c.bf16 %v1557_v41, %v1557_v41 }
 0x5ce   :  { %1635 = vmatmul.bf16.vlgmr.msrb.gmra.mxu0 %v1558_v47 }
 0x64b   :  { %v1636_v48 = vpop.f32.mrf.mxu0 }
 0x64c   :  { %v1637_v51 = vadd.f32 %v2069_v61, %v1636_v48 }
 0x64e   :  { %1640 = vst [vmem:[#allocation7] sm:$0xff] %v1637_v51 }
 0x64f   :  { %1651 = dma.vmem_to_hbm [thread:$0]  %s1647_s1, 128, %s1649_s10, [#allocation4]  }
 0x653   :  { %v1638_v53 = vpop.f32.mrf.mxu0 }
 0x654   :  { %2274 = dma.done.wait [#allocation4], 128  }
 0x655   :  { %2275 = vsyncadd [#allocation4], 4294967168 }
 0x656   :  { %1656 = vsyncpa [#allocation3], 1 }
 0x657   :  { %1657 = vsyncpa [#allocation6], 1 }
 0x658   :  { %1658 = vsyncpa [#allocation4], 1 }

</bundles_post_ra>
